<compile_context>
chip_gen: v7x
topology: tpu7x:2x2x1
jax: 0.10.0
libtpu: 0.0.40
codegen_flags: <defaults>
</compile_context>

<pallas_src>
import jax
import jax.numpy as jnp
from jax.experimental import pallas as pl
from jax.experimental.pallas import tpu as pltpu


def _round_up(x, m):
    return ((x + m - 1) // m) * m


def mlp_kernel(x_ref, w1_ref, b1_ref, w2_ref, b2_ref, w3_ref, b3_ref, o_ref):
    # x tile: (TB, 896) bf16; weights bf16; biases f32; output (TB, 128) f32.
    x = x_ref[...]
    h1 = jnp.dot(x, w1_ref[...], preferred_element_type=jnp.float32) + b1_ref[...]
    h1 = jnp.maximum(h1, 0.0).astype(jnp.bfloat16)
    h2 = jnp.dot(h1, w2_ref[...], preferred_element_type=jnp.float32) + b2_ref[...]
    h2 = jnp.maximum(h2, 0.0).astype(jnp.bfloat16)
    logits = jnp.dot(h2, w3_ref[...], preferred_element_type=jnp.float32) + b3_ref[...]
    o_ref[...] = logits.astype(o_ref.dtype)


def mlp_forward(x_nchw, params):
    """x_nchw: (B, 1, 28, 28) float32, NCHW like the PyTorch module."""
    w1, b1, w2, b2, w3, b3 = params
    B = x_nchw.shape[0]
    # nn.Flatten(): flatten everything after the batch dim (row-major, matches PyTorch).
    x = x_nchw.reshape(B, -1).astype(jnp.float32)  # (B, 784)
    K = x.shape[1]                                  # 784
    H = w1.shape[1]                                 # 512
    N_OUT = w3.shape[1]                             # 10

    K_PAD = _round_up(K, 128)                       # 896 = 7*128
    N_PAD = _round_up(N_OUT, 128)                   # 128

    # Batch tile: at least 16 rows (bf16 sublane packing), at most 256.
    TB = min(256, _round_up(max(B, 1), 16))
    B_PAD = _round_up(B, TB)

    # Zero-pad + cast operands (value-preserving: padded K columns of x are 0,
    # padded rows of w1 are 0, padded output columns are sliced off below).
    xp = jnp.pad(x, ((0, B_PAD - B), (0, K_PAD - K))).astype(jnp.bfloat16)
    w1p = jnp.pad(w1, ((0, K_PAD - K), (0, 0))).astype(jnp.bfloat16)
    w2p = w2.astype(jnp.bfloat16)
    w3p = jnp.pad(w3, ((0, 0), (0, N_PAD - N_OUT))).astype(jnp.bfloat16)
    b1p = b1.astype(jnp.float32)
    b2p = b2.astype(jnp.float32)
    b3p = jnp.pad(b3, ((0, 0), (0, N_PAD - N_OUT))).astype(jnp.float32)

    grid = (B_PAD // TB,)

    # Weights/biases: full-extent blocks, same block every grid step -> VMEM resident.
    def resident(a):
        return pl.BlockSpec(a.shape, lambda i: (0,) * a.ndim)

    out = pl.pallas_call(
        mlp_kernel,
        out_shape=jax.ShapeDtypeStruct((B_PAD, N_PAD), jnp.float32),
        grid=grid,
        in_specs=[
            pl.BlockSpec((TB, K_PAD), lambda i: (i, 0)),   # x: batch-tiled
            resident(w1p), resident(b1p),
            resident(w2p), resident(b2p),
            resident(w3p), resident(b3p),
        ],
        out_specs=pl.BlockSpec((TB, N_PAD), lambda i: (i, 0)),
        compiler_params=pltpu.CompilerParams(
            dimension_semantics=("parallel",),
            vmem_limit_bytes=32 << 20,
        ),
    )(xp, w1p, b1p, w2p, b2p, w3p, b3p)

    return out[:B, :N_OUT]


def init_params(key):
    """Deterministic init matching PyTorch nn.Linear default:
    U(-1/sqrt(fan_in), 1/sqrt(fan_in)) for both weight and bias."""
    def linear(key, fan_in, fan_out):
        kw, kb = jax.random.split(key)
        bound = 1.0 / jnp.sqrt(jnp.float32(fan_in))
        w = jax.random.uniform(kw, (fan_in, fan_out), jnp.float32, -bound, bound)
        b = jax.random.uniform(kb, (1, fan_out), jnp.float32, -bound, bound)
        return w, b

    k1, k2, k3 = jax.random.split(key, 3)
    w1, b1 = linear(k1, 28 * 28, 512)
    w2, b2 = linear(k2, 512, 512)
    w3, b3 = linear(k3, 512, 10)
    return (w1, b1, w2, b2, w3, b3)


if __name__ == "__main__":
    key = jax.random.PRNGKey(0)
    k_params, k_x = jax.random.split(key)
    params = init_params(k_params)

    # Small example batch, NCHW like MNIST input to this module.
    x = jax.random.normal(k_x, (2, 1, 28, 28), jnp.float32)

    logits = mlp_forward(x, params)
    jax.block_until_ready(logits)

    # Correctness check against plain-JAX f32 reference (bf16 operands in the
    # kernel -> slightly looser tolerance; accumulation is still f32).
    w1, b1, w2, b2, w3, b3 = params
    xf = x.reshape(2, -1)
    ref = jnp.maximum(xf @ w1 + b1, 0.0)
    ref = jnp.maximum(ref @ w2 + b2, 0.0)
    ref = ref @ w3 + b3
    assert logits.shape == (2, 10)
    assert jnp.allclose(logits, ref, atol=5e-2, rtol=5e-2), (
        float(jnp.max(jnp.abs(logits - ref))))

    print("KERNEL_OK")
</pallas_src>

<mosaic_0001>
module attributes {stable_mosaic.version = 11 : i64} {
  func.func @mlp_kernel(%arg0: i32, %arg1: memref<16x896xbf16, #tpu.memory_space<vmem>>, %arg2: memref<896x512xbf16, #tpu.memory_space<vmem>>, %arg3: memref<1x512xf32, #tpu.memory_space<vmem>>, %arg4: memref<512x512xbf16, #tpu.memory_space<vmem>>, %arg5: memref<1x512xf32, #tpu.memory_space<vmem>>, %arg6: memref<512x128xbf16, #tpu.memory_space<vmem>>, %arg7: memref<1x128xf32, #tpu.memory_space<vmem>>, %arg8: memref<16x128xf32, #tpu.memory_space<vmem>>) attributes {dimension_semantics = [#tpu.dimension_semantics<parallel>], iteration_bounds = array<i64: 1>, scalar_prefetch = 0 : i64, scratch_operands = 0 : i64, tpu.core_type = #tpu.core_type<tc>, window_params = [{transform_indices = @transform_0, window_bounds = array<i64: 16, 896>}, {pipeline_mode = #tpu.pipeline_mode<synchronous>, transform_indices = @transform_1, window_bounds = array<i64: 896, 512>}, {pipeline_mode = #tpu.pipeline_mode<synchronous>, transform_indices = @transform_2, window_bounds = array<i64: 1, 512>}, {pipeline_mode = #tpu.pipeline_mode<synchronous>, transform_indices = @transform_3, window_bounds = array<i64: 512, 512>}, {pipeline_mode = #tpu.pipeline_mode<synchronous>, transform_indices = @transform_4, window_bounds = array<i64: 1, 512>}, {pipeline_mode = #tpu.pipeline_mode<synchronous>, transform_indices = @transform_5, window_bounds = array<i64: 512, 128>}, {pipeline_mode = #tpu.pipeline_mode<synchronous>, transform_indices = @transform_6, window_bounds = array<i64: 1, 128>}, {transform_indices = @transform_7, window_bounds = array<i64: 16, 128>}]} {
    %c0 = arith.constant 0 : index
    %c0_0 = arith.constant 0 : index
    %0 = vector.load %arg1[%c0, %c0_0] : memref<16x896xbf16, #tpu.memory_space<vmem>>, vector<16x896xbf16>
    %c0_1 = arith.constant 0 : index
    %c0_2 = arith.constant 0 : index
    %1 = vector.load %arg2[%c0_1, %c0_2] : memref<896x512xbf16, #tpu.memory_space<vmem>>, vector<896x512xbf16>
    %cst = arith.constant dense<0.000000e+00> : vector<16x512xf32>
    %2 = tpu.matmul %0, %1, %cst {dimension_numbers = #tpu.dot_dimension_numbers<[1], [0], [0], [1], [0, 0, 1, 1], [], []>} : vector<16x896xbf16>, vector<896x512xbf16>, vector<16x512xf32> -> vector<16x512xf32>
    %c0_3 = arith.constant 0 : index
    %c0_4 = arith.constant 0 : index
    %3 = vector.load %arg3[%c0_3, %c0_4] : memref<1x512xf32, #tpu.memory_space<vmem>>, vector<1x512xf32>
    %4 = vector.broadcast %3 : vector<1x512xf32> to vector<16x512xf32>
    %5 = arith.addf %2, %4 : vector<16x512xf32>
    %cst_5 = arith.constant 0.000000e+00 : f32
    %6 = vector.broadcast %cst_5 : f32 to vector<16x512xf32>
    %7 = arith.maximumf %5, %6 : vector<16x512xf32>
    %8 = arith.truncf %7 : vector<16x512xf32> to vector<16x512xbf16>
    %c0_6 = arith.constant 0 : index
    %c0_7 = arith.constant 0 : index
    %9 = vector.load %arg4[%c0_6, %c0_7] : memref<512x512xbf16, #tpu.memory_space<vmem>>, vector<512x512xbf16>
    %cst_8 = arith.constant dense<0.000000e+00> : vector<16x512xf32>
    %10 = tpu.matmul %8, %9, %cst_8 {dimension_numbers = #tpu.dot_dimension_numbers<[1], [0], [0], [1], [0, 0, 1, 1], [], []>} : vector<16x512xbf16>, vector<512x512xbf16>, vector<16x512xf32> -> vector<16x512xf32>
    %c0_9 = arith.constant 0 : index
    %c0_10 = arith.constant 0 : index
    %11 = vector.load %arg5[%c0_9, %c0_10] : memref<1x512xf32, #tpu.memory_space<vmem>>, vector<1x512xf32>
    %12 = vector.broadcast %11 : vector<1x512xf32> to vector<16x512xf32>
    %13 = arith.addf %10, %12 : vector<16x512xf32>
    %cst_11 = arith.constant 0.000000e+00 : f32
    %14 = vector.broadcast %cst_11 : f32 to vector<16x512xf32>
    %15 = arith.maximumf %13, %14 : vector<16x512xf32>
    %16 = arith.truncf %15 : vector<16x512xf32> to vector<16x512xbf16>
    %c0_12 = arith.constant 0 : index
    %c0_13 = arith.constant 0 : index
    %17 = vector.load %arg6[%c0_12, %c0_13] : memref<512x128xbf16, #tpu.memory_space<vmem>>, vector<512x128xbf16>
    %cst_14 = arith.constant dense<0.000000e+00> : vector<16x128xf32>
    %18 = tpu.matmul %16, %17, %cst_14 {dimension_numbers = #tpu.dot_dimension_numbers<[1], [0], [0], [1], [0, 0, 1, 1], [], []>} : vector<16x512xbf16>, vector<512x128xbf16>, vector<16x128xf32> -> vector<16x128xf32>
    %c0_15 = arith.constant 0 : index
    %c0_16 = arith.constant 0 : index
    %19 = vector.load %arg7[%c0_15, %c0_16] : memref<1x128xf32, #tpu.memory_space<vmem>>, vector<1x128xf32>
    %20 = vector.broadcast %19 : vector<1x128xf32> to vector<16x128xf32>
    %21 = arith.addf %18, %20 : vector<16x128xf32>
    %c0_17 = arith.constant 0 : index
    %c0_18 = arith.constant 0 : index
    %22 = vector.load %arg8[%c0_17, %c0_18] : memref<16x128xf32, #tpu.memory_space<vmem>>, vector<16x128xf32>
    tpu.vector_store %arg8[%c0_17, %c0_18], %21 {strides = array<i32>} : memref<16x128xf32, #tpu.memory_space<vmem>>, vector<16x128xf32>,
    return
  }
  func.func @transform_0(%arg0: i32) -> (i32, i32) {
    %c0_i32 = arith.constant 0 : i32
    %c0_i32_0 = arith.constant 0 : i32
    return %arg0, %c0_i32 : i32, i32
  }
  func.func @transform_1(%arg0: i32) -> (i32, i32) {
    %c0_i32 = arith.constant 0 : i32
    %c0_i32_0 = arith.constant 0 : i32
    %c0_i32_1 = arith.constant 0 : i32
    return %c0_i32, %c0_i32_0 : i32, i32
  }
  func.func @transform_2(%arg0: i32) -> (i32, i32) {
    %c0_i32 = arith.constant 0 : i32
    %c0_i32_0 = arith.constant 0 : i32
    %c0_i32_1 = arith.constant 0 : i32
    return %c0_i32, %c0_i32_0 : i32, i32
  }
  func.func @transform_3(%arg0: i32) -> (i32, i32) {
    %c0_i32 = arith.constant 0 : i32
    %c0_i32_0 = arith.constant 0 : i32
    %c0_i32_1 = arith.constant 0 : i32
    return %c0_i32, %c0_i32_0 : i32, i32
  }
  func.func @transform_4(%arg0: i32) -> (i32, i32) {
    %c0_i32 = arith.constant 0 : i32
    %c0_i32_0 = arith.constant 0 : i32
    %c0_i32_1 = arith.constant 0 : i32
    return %c0_i32, %c0_i32_0 : i32, i32
  }
  func.func @transform_5(%arg0: i32) -> (i32, i32) {
    %c0_i32 = arith.constant 0 : i32
    %c0_i32_0 = arith.constant 0 : i32
    %c0_i32_1 = arith.constant 0 : i32
    return %c0_i32, %c0_i32_0 : i32, i32
  }
  func.func @transform_6(%arg0: i32) -> (i32, i32) {
    %c0_i32 = arith.constant 0 : i32
    %c0_i32_0 = arith.constant 0 : i32
    %c0_i32_1 = arith.constant 0 : i32
    return %c0_i32, %c0_i32_0 : i32, i32
  }
  func.func @transform_7(%arg0: i32) -> (i32, i32) {
    %c0_i32 = arith.constant 0 : i32
    %c0_i32_0 = arith.constant 0 : i32
    return %arg0, %c0_i32 : i32, i32
  }
}

</mosaic_0001>

<bundles_post_ra>
// kernel: tpu_custom_call.1
= control target key start
LH: loop header
LB: loop body
LE: loop exit
PB: predicated region body
PF: predicated region fallthrough
CT: control target
= control target key end

     0   :  { %12 = vsyncpa [#allocation3], 0  ;;  %s4537_s0 = inlined_call_operand.hbm [shape: bf16[16,896], index: 0, kind: input, shape index: {}]   ;;  %s4538_s1 = inlined_call_operand.hbm [shape: bf16[896,512], index: 1, kind: input, shape index: {}]   ;;  %s4539_s2 = inlined_call_operand.vmem [shape: f32[1,512], index: 2, kind: input, shape index: {}]   ;;  %s4540_s3 = inlined_call_operand.hbm [shape: bf16[512,512], index: 3, kind: input, shape index: {}]   ;;  %s4541_s4 = inlined_call_operand.vmem [shape: f32[1,512], index: 4, kind: input, shape index: {}]   ;;  %s4542_s5 = inlined_call_operand.hbm [shape: bf16[512,128], index: 5, kind: input, shape index: {}]   ;;  %s4543_s6 = inlined_call_operand.vmem [shape: f32[1,128], index: 6, kind: input, shape index: {}]   ;;  %s4544_s7 = inlined_call_operand.hbm [shape: f32[16,128], index: 7, kind: output, shape index: {}]  }
   0x1   :  { %13 = vsyncpa [#allocation6], 0 }
   0x2   :  { %14 = vsyncpa [#allocation9], 0 }
   0x3   :  { %15 = vsyncpa [#allocation4], 0  ;;  %s4375_s24 = smov [#allocation5]   ;;  %s4257_s28 = scalar_lea.hbm %s4538_s1, 28672 }
   0x4   :  { %s33_s25 = sshll.u32 %s4375_s24, 4  ;;  %p4258_p0 = scmp.ne.s32.totalorder %s4538_s1, %s4257_s28  ;;  %s34_s25 = int_to_ptr.vmem [resolvable:$true] %s33_s25 }
   0x5   :  { %p4261_p1 = scmp.lt.u32.totalorder %s4257_s28, %s4538_s1 }
   0x7   :  { %p4263_p2 = pnand %p4261_p1, %p4258_p0 }
   0x9   :  { %4266 = shalt.err (!%p4263_p2)
}
   0xa   :  { %s4267_s10 = scalar_lea.vmem %s34_s25, 28672  ;;  %p4272_p4 = scmp.lt.s32.totalorder %s34_s25, %s34_s25 }
   0xb   :  { %p4268_p3 = scmp.ne.s32.totalorder %s34_s25, %s4267_s10  ;;  %p4273_p5 = scmp.lt.s32.totalorder %s4267_s10, %s4267_s10 }
   0xd   :  { %p4274_p6 = por %p4273_p5, %p4272_p4 }
   0xf   :  { %p4275_p7 = pnand %p4274_p6, %p4268_p3 }
  0x11   :  { %4278 = shalt.err (!%p4275_p7)
}
  0x12   :  { %s4376_s11 = smov 256   ;;  %s4377_s12 = smov 16  }
  0x13   :  { %39 = dma.hbm_to_vmem [thread:$0]  %s4538_s1, 28672, %s34_s25, [#allocation6], %s4376_s11, %s4376_s11, %s4377_s12  }
  0x14   :  { %s4378_s15 = smov [#allocation2]   ;;  %s4279_s19 = scalar_lea.hbm %s4537_s0, 896 }
  0x15   :  { %s21_s16 = sshll.u32 %s4378_s15, 4  ;;  %p4280_p8 = scmp.ne.s32.totalorder %s4537_s0, %s4279_s19  ;;  %s22_s16 = int_to_ptr.vmem [resolvable:$true] %s21_s16 }
  0x16   :  { %p4283_p9 = scmp.lt.u32.totalorder %s4279_s19, %s4537_s0 }
  0x18   :  { %p4285_p10 = pnand %p4283_p9, %p4280_p8 }
  0x1a   :  { %4288 = shalt.err (!%p4285_p10)
}
  0x1b   :  { %s4289_s24 = scalar_lea.vmem %s22_s16, 896  ;;  %p4294_p12 = scmp.lt.s32.totalorder %s22_s16, %s22_s16 }
  0x1c   :  { %p4290_p11 = scmp.ne.s32.totalorder %s22_s16, %s4289_s24  ;;  %p4295_p13 = scmp.lt.s32.totalorder %s4289_s24, %s4289_s24 }
  0x1e   :  { %p4296_p0 = por %p4295_p13, %p4294_p12 }
  0x20   :  { %p4297_p1 = pnand %p4296_p0, %p4290_p11 }
  0x22   :  { %4300 = shalt.err (!%p4297_p1)
}
  0x23   :  { %s4379_s1 = smov 448   ;;  %s4380_s25 = smov 28  }
  0x24   :  { %27 = dma.hbm_to_vmem [thread:$0]  %s4537_s0, 896, %s22_s16, [#allocation3], %s4379_s1, %s4379_s1, %s4380_s25  }
  0x25   :  { %s4381_s28 = smov [#allocation7]   ;;  %s4382_s30 = smov [#allocation8]  }
  0x26   :  { %s47_s29 = sshll.u32 %s4381_s28, 4  ;;  %s61_s8 = sshll.u32 %s4382_s30, 4  ;;  %s48_s29 = int_to_ptr.vmem [resolvable:$true] %s47_s29  ;;  %s4456_s8 = int_to_ptr.vmem [resolvable:$true] %s61_s8 }
  0x27   :  { %s4301_s13 = scalar_lea.hbm %s4540_s3, 16384 }
  0x28   :  { %p4302_p2 = scmp.ne.s32.totalorder %s4540_s3, %s4301_s13  ;;  %p4305_p3 = scmp.lt.u32.totalorder %s4301_s13, %s4540_s3 }
  0x2a   :  { %p4307_p4 = pnand %p4305_p3, %p4302_p2 }
  0x2c   :  { %4310 = shalt.err (!%p4307_p4)
}
  0x2d   :  { %s4311_s0 = scalar_lea.vmem %s48_s29, 16384  ;;  %p4316_p6 = scmp.lt.s32.totalorder %s48_s29, %s48_s29 }
  0x2e   :  { %p4312_p5 = scmp.ne.s32.totalorder %s48_s29, %s4311_s0  ;;  %p4317_p7 = scmp.lt.s32.totalorder %s4311_s0, %s4311_s0 }
  0x30   :  { %p4318_p8 = por %p4317_p7, %p4316_p6 }
  0x32   :  { %p4319_p9 = pnand %p4318_p8, %p4312_p5 }
  0x34   :  { %4322 = shalt.err (!%p4319_p9)
}
  0x35   :  { %53 = dma.hbm_to_vmem [thread:$0]  %s4540_s3, 16384, %s48_s29, [#allocation6], %s4376_s11, %s4376_s11, %s4377_s12  }
  0x36   :  { %s4323_s22 = scalar_lea.hbm %s4542_s5, 4096 }
  0x37   :  { %p4324_p10 = scmp.ne.s32.totalorder %s4542_s5, %s4323_s22  ;;  %p4327_p11 = scmp.lt.u32.totalorder %s4323_s22, %s4542_s5 }
  0x39   :  { %p4329_p12 = pnand %p4327_p11, %p4324_p10 }
  0x3b   :  { %4332 = shalt.err (!%p4329_p12)
}
  0x3c   :  { %s4333_s26 = scalar_lea.vmem %s4456_s8, 4096  ;;  %p4338_p0 = scmp.lt.s32.totalorder %s4456_s8, %s4456_s8 }
  0x3d   :  { %p4334_p13 = scmp.ne.s32.totalorder %s4456_s8, %s4333_s26  ;;  %p4339_p1 = scmp.lt.s32.totalorder %s4333_s26, %s4333_s26 }
  0x3f   :  { %p4340_p2 = por %p4339_p1, %p4338_p0 }
  0x41   :  { %p4341_p3 = pnand %p4340_p2, %p4334_p13 }
  0x43   :  { %4344 = shalt.err (!%p4341_p3)
}
  0x44   :  { %s4383_s3 = smov 64   ;;  %s4384_s11 = smov 4  }
  0x45   :  { %67 = dma.hbm_to_vmem [thread:$0]  %s4542_s5, 4096, %s4456_s8, [#allocation9], %s4383_s3, %s4383_s3, %s4384_s11  }
  0x46   :  { %4367 = dma.done.wait [#allocation3], 896  }
  0x47   :  { %4368 = vsyncadd [#allocation3], 4294966400 }
  0x48   :  { %4369 = dma.done.wait [#allocation6], 45056  }
  0x49   :  { %4370 = vsyncadd [#allocation6], 4294922240 }
  0x4a   :  { %4371 = dma.done.wait [#allocation9], 4096  }
  0x4b   :  { %4372 = vsyncadd [#allocation9], 4294963200  ;;  %v3687_v0 = vld [vmem:[#allocation5 + $0x4] ss:$16 sps:$4 sm:$0xff]   ;;  %v3689_v1 = vld [vmem:[#allocation5 + $0xc] ss:$16 sps:$4 sm:$0xff]  }
  0x4c   :  { %1493 = vmatprep.subr.bf16.mxu0 %v3687_v0  ;;  %v3691_v2 = vld [vmem:[#allocation5] ss:$16 sps:$4 sm:$0xff]   ;;  %v3692_v3 = vld [vmem:[#allocation5 + $0x8] ss:$16 sps:$4 sm:$0xff]   ;;  %1665 = vmatprep.subr.bf16.mxu1 %v3689_v1  ;;  %v3693_v4 = vld [vmem:[#allocation5 + $0x24] ss:$16 sps:$4 sm:$0xff]  }
  0x4d   :  { %1494 = vmatpush1.bf16.msra.mxu0 %v3691_v2  ;;  %1666 = vmatpush1.bf16.msra.mxu1 %v3692_v3  ;;  %v3695_v5 = vld [vmem:[#allocation5 + $0x2c] ss:$16 sps:$4 sm:$0xff]   ;;  %v3697_v6 = vld [vmem:[#allocation5 + $0x20] ss:$16 sps:$4 sm:$0xff]   ;;  %v3698_v7 = vld [vmem:[#allocation5 + $0x28] ss:$16 sps:$4 sm:$0xff]  }
  0x4e   :  { %1495 = vmatprep.subr.bf16.mxu0 %v3693_v4  ;;  %1667 = vmatprep.subr.bf16.mxu1 %v3695_v5  ;;  %v3699_v8 = vld [vmem:[#allocation5 + $0x44] ss:$16 sps:$4 sm:$0xff]   ;;  %v3701_v9 = vld [vmem:[#allocation5 + $0x4c] ss:$16 sps:$4 sm:$0xff]   ;;  %v3703_v10 = vld [vmem:[#allocation5 + $0x40] ss:$16 sps:$4 sm:$0xff]  }
  0x4f   :  { %v3704_v11 = vld [vmem:[#allocation5 + $0x48] ss:$16 sps:$4 sm:$0xff]   ;;  %v3705_v12 = vld [vmem:[#allocation5 + $0x64] ss:$16 sps:$4 sm:$0xff]   ;;  %v3707_v13 = vld [vmem:[#allocation5 + $0x6c] ss:$16 sps:$4 sm:$0xff]  }
  0x50   :  { %v3709_v14 = vld [vmem:[#allocation5 + $0x60] ss:$16 sps:$4 sm:$0xff]   ;;  %v3710_v15 = vld [vmem:[#allocation5 + $0x68] ss:$16 sps:$4 sm:$0xff]   ;;  %v3711_v16 = vld [vmem:[#allocation5 + $0x84] ss:$16 sps:$4 sm:$0xff]  }
  0x51   :  { %1496 = vmatpush1.bf16.msra.mxu0 %v3697_v6  ;;  %1668 = vmatpush1.bf16.msra.mxu1 %v3698_v7  ;;  %v3713_v17 = vld [vmem:[#allocation5 + $0x8c] ss:$16 sps:$4 sm:$0xff]   ;;  %v3715_v18 = vld [vmem:[#allocation5 + $0x80] ss:$16 sps:$4 sm:$0xff]   ;;  %v3716_v19 = vld [vmem:[#allocation5 + $0x88] ss:$16 sps:$4 sm:$0xff]  }
  0x52   :  { %1497 = vmatprep.subr.bf16.mxu0 %v3699_v8  ;;  %1669 = vmatprep.subr.bf16.mxu1 %v3701_v9  ;;  %v3717_v20 = vld [vmem:[#allocation5 + $0xa4] ss:$16 sps:$4 sm:$0xff]   ;;  %v3719_v21 = vld [vmem:[#allocation5 + $0xac] ss:$16 sps:$4 sm:$0xff]   ;;  %v3721_v22 = vld [vmem:[#allocation5 + $0xa0] ss:$16 sps:$4 sm:$0xff]  }
  0x53   :  { %v3722_v23 = vld [vmem:[#allocation5 + $0xa8] ss:$16 sps:$4 sm:$0xff]   ;;  %v3723_v24 = vld [vmem:[#allocation5 + $0xc4] ss:$16 sps:$4 sm:$0xff]   ;;  %v3725_v25 = vld [vmem:[#allocation5 + $0xcc] ss:$16 sps:$4 sm:$0xff]  }
  0x54   :  { %v3727_v26 = vld [vmem:[#allocation5 + $0xc0] ss:$16 sps:$4 sm:$0xff]   ;;  %v3728_v27 = vld [vmem:[#allocation5 + $0xc8] ss:$16 sps:$4 sm:$0xff]   ;;  %v3729_v28 = vld [vmem:[#allocation5 + $0xe4] ss:$16 sps:$4 sm:$0xff]  }
  0x55   :  { %1498 = vmatpush1.bf16.msra.mxu0 %v3703_v10  ;;  %1670 = vmatpush1.bf16.msra.mxu1 %v3704_v11  ;;  %v3731_v29 = vld [vmem:[#allocation5 + $0xec] ss:$16 sps:$4 sm:$0xff]   ;;  %v3733_v30 = vld [vmem:[#allocation5 + $0xe0] ss:$16 sps:$4 sm:$0xff]   ;;  %v3734_v31 = vld [vmem:[#allocation5 + $0xe8] ss:$16 sps:$4 sm:$0xff]  }
  0x56   :  { %1499 = vmatprep.subr.bf16.mxu0 %v3705_v12  ;;  %1671 = vmatprep.subr.bf16.mxu1 %v3707_v13  ;;  %v3735_v32 = vld [vmem:[#allocation5 + $0x104] ss:$16 sps:$4 sm:$0xff]   ;;  %v3737_v33 = vld [vmem:[#allocation5 + $0x10c] ss:$16 sps:$4 sm:$0xff]   ;;  %v3739_v34 = vld [vmem:[#allocation5 + $0x100] ss:$16 sps:$4 sm:$0xff]  }
  0x57   :  { %v3740_v35 = vld [vmem:[#allocation5 + $0x108] ss:$16 sps:$4 sm:$0xff]   ;;  %v3741_v36 = vld [vmem:[#allocation5 + $0x124] ss:$16 sps:$4 sm:$0xff]   ;;  %v3743_v37 = vld [vmem:[#allocation5 + $0x12c] ss:$16 sps:$4 sm:$0xff]  }
  0x58   :  { %v3745_v38 = vld [vmem:[#allocation5 + $0x120] ss:$16 sps:$4 sm:$0xff]   ;;  %v3746_v39 = vld [vmem:[#allocation5 + $0x128] ss:$16 sps:$4 sm:$0xff]   ;;  %v3747_v40 = vld [vmem:[#allocation5 + $0x144] ss:$16 sps:$4 sm:$0xff]  }
  0x59   :  { %1500 = vmatpush1.bf16.msra.mxu0 %v3709_v14  ;;  %1672 = vmatpush1.bf16.msra.mxu1 %v3710_v15  ;;  %v3749_v41 = vld [vmem:[#allocation5 + $0x14c] ss:$16 sps:$4 sm:$0xff]   ;;  %v3751_v42 = vld [vmem:[#allocation5 + $0x140] ss:$16 sps:$4 sm:$0xff]   ;;  %v3752_v43 = vld [vmem:[#allocation5 + $0x148] ss:$16 sps:$4 sm:$0xff]  }
  0x5a   :  { %1501 = vmatprep.subr.bf16.mxu0 %v3711_v16  ;;  %1673 = vmatprep.subr.bf16.mxu1 %v3713_v17  ;;  %v3753_v44 = vld [vmem:[#allocation5 + $0x164] ss:$16 sps:$4 sm:$0xff]   ;;  %v3755_v45 = vld [vmem:[#allocation5 + $0x16c] ss:$16 sps:$4 sm:$0xff]   ;;  %v3757_v46 = vld [vmem:[#allocation5 + $0x160] ss:$16 sps:$4 sm:$0xff]  }
  0x5b   :  { %v3758_v47 = vld [vmem:[#allocation5 + $0x168] ss:$16 sps:$4 sm:$0xff]   ;;  %v3759_v49 = vld [vmem:[#allocation5 + $0x184] ss:$16 sps:$4 sm:$0xff]   ;;  %v3761_v50 = vld [vmem:[#allocation5 + $0x18c] ss:$16 sps:$4 sm:$0xff]  }
  0x5c   :  { %v3785_v48 = vld [vmem:[#allocation2 + $0x4] ss:$28 sps:$4 sm:$0xff]   ;;  %v3763_v51 = vld [vmem:[#allocation5 + $0x180] ss:$16 sps:$4 sm:$0xff]   ;;  %v3765_v53 = vld [vmem:[#allocation5 + $0x1a4] ss:$16 sps:$4 sm:$0xff]  }
  0x5d   :  { %1502 = vmatpush1.bf16.msra.mxu0 %v3715_v18  ;;  %1674 = vmatpush1.bf16.msra.mxu1 %v3716_v19  ;;  %v3764_v52 = vld [vmem:[#allocation5 + $0x188] ss:$16 sps:$4 sm:$0xff]   ;;  %v3767_v54 = vld [vmem:[#allocation5 + $0x1ac] ss:$16 sps:$4 sm:$0xff]   ;;  %v3769_v55 = vld [vmem:[#allocation5 + $0x1a0] ss:$16 sps:$4 sm:$0xff]  }
  0x5e   :  { %1503 = vmatprep.subr.bf16.mxu0 %v3717_v20  ;;  %1675 = vmatprep.subr.bf16.mxu1 %v3719_v21  ;;  %v3770_v56 = vld [vmem:[#allocation5 + $0x1a8] ss:$16 sps:$4 sm:$0xff]   ;;  %v3771_v57 = vld [vmem:[#allocation5 + $0x1c4] ss:$16 sps:$4 sm:$0xff]   ;;  %v3773_v58 = vld [vmem:[#allocation5 + $0x1cc] ss:$16 sps:$4 sm:$0xff]  }
  0x5f   :  { %1525 = vmatprep.mubr.bf16.mxu0 %v3785_v48  ;;  %1697 = vmatprep.mubr.bf16.mxu1 %v3785_v48  ;;  %v3775_v59 = vld [vmem:[#allocation5 + $0x1c0] ss:$16 sps:$4 sm:$0xff]   ;;  %v3776_v60 = vld [vmem:[#allocation5 + $0x1c8] ss:$16 sps:$4 sm:$0xff]   ;;  %v3777_v61 = vld [vmem:[#allocation5 + $0x1e4] ss:$16 sps:$4 sm:$0xff]  }
  0x60   :  { %v3779_v62 = vld [vmem:[#allocation5 + $0x1ec] ss:$16 sps:$4 sm:$0xff]   ;;  %v3781_v63 = vld [vmem:[#allocation5 + $0x1e0] ss:$16 sps:$4 sm:$0xff]   ;;  %v3782_v0 = vld [vmem:[#allocation5 + $0x1e8] ss:$16 sps:$4 sm:$0xff]  }
  0x61   :  { %1504 = vmatpush1.bf16.msra.mxu0 %v3721_v22  ;;  %1676 = vmatpush1.bf16.msra.mxu1 %v3722_v23  ;;  %v3788_v1 = vld [vmem:[#allocation5 + $0x204] ss:$16 sps:$4 sm:$0xff]   ;;  %v3791_v2 = vld [vmem:[#allocation5 + $0x20c] ss:$16 sps:$4 sm:$0xff]   ;;  %v3786_v4 = vld [vmem:[#allocation5 + $0x200] ss:$16 sps:$4 sm:$0xff]  }
  0x62   :  { %1505 = vmatprep.subr.bf16.mxu0 %v3723_v24  ;;  %1677 = vmatprep.subr.bf16.mxu1 %v3725_v25  ;;  %v3783_v3 = vld [vmem:[#allocation2] ss:$28 sps:$4 sm:$0xff]   ;;  %v3797_v7 = vld [vmem:[#allocation5 + $0x22c] ss:$16 sps:$4 sm:$0xff]   ;;  %v3792_v8 = vld [vmem:[#allocation5 + $0x220] ss:$16 sps:$4 sm:$0xff]  }
  0x63   :  { %v3789_v5 = vld [vmem:[#allocation5 + $0x208] ss:$16 sps:$4 sm:$0xff]   ;;  %v3794_v6 = vld [vmem:[#allocation5 + $0x224] ss:$16 sps:$4 sm:$0xff]   ;;  %v3803_v11 = vld [vmem:[#allocation5 + $0x24c] ss:$16 sps:$4 sm:$0xff]  }
  0x64   :  { %v3795_v9 = vld [vmem:[#allocation5 + $0x228] ss:$16 sps:$4 sm:$0xff]   ;;  %v3800_v10 = vld [vmem:[#allocation5 + $0x244] ss:$16 sps:$4 sm:$0xff]   ;;  %v3798_v12 = vld [vmem:[#allocation5 + $0x240] ss:$16 sps:$4 sm:$0xff]  }
  0x65   :  { %1506 = vmatpush1.bf16.msra.mxu0 %v3727_v26  ;;  %1678 = vmatpush1.bf16.msra.mxu1 %v3728_v27  ;;  %v3801_v13 = vld [vmem:[#allocation5 + $0x248] ss:$16 sps:$4 sm:$0xff]   ;;  %v3806_v14 = vld [vmem:[#allocation5 + $0x264] ss:$16 sps:$4 sm:$0xff]   ;;  %v3809_v15 = vld [vmem:[#allocation5 + $0x26c] ss:$16 sps:$4 sm:$0xff]  }
  0x66   :  { %1507 = vmatprep.subr.bf16.mxu0 %v3729_v28  ;;  %1679 = vmatprep.subr.bf16.mxu1 %v3731_v29  ;;  %v3804_v16 = vld [vmem:[#allocation5 + $0x260] ss:$16 sps:$4 sm:$0xff]   ;;  %v3807_v17 = vld [vmem:[#allocation5 + $0x268] ss:$16 sps:$4 sm:$0xff]   ;;  %v3812_v18 = vld [vmem:[#allocation5 + $0x284] ss:$16 sps:$4 sm:$0xff]  }
  0x67   :  { %v3815_v19 = vld [vmem:[#allocation5 + $0x28c] ss:$16 sps:$4 sm:$0xff]   ;;  %v3810_v20 = vld [vmem:[#allocation5 + $0x280] ss:$16 sps:$4 sm:$0xff]   ;;  %v3813_v21 = vld [vmem:[#allocation5 + $0x288] ss:$16 sps:$4 sm:$0xff]  }
  0x68   :  { %v3818_v22 = vld [vmem:[#allocation5 + $0x2a4] ss:$16 sps:$4 sm:$0xff]   ;;  %v3821_v23 = vld [vmem:[#allocation5 + $0x2ac] ss:$16 sps:$4 sm:$0xff]   ;;  %v3816_v24 = vld [vmem:[#allocation5 + $0x2a0] ss:$16 sps:$4 sm:$0xff]  }
  0x69   :  { %1508 = vmatpush1.bf16.msra.mxu0 %v3733_v30  ;;  %1680 = vmatpush1.bf16.msra.mxu1 %v3734_v31  ;;  %v3819_v25 = vld [vmem:[#allocation5 + $0x2a8] ss:$16 sps:$4 sm:$0xff]   ;;  %v3824_v26 = vld [vmem:[#allocation5 + $0x2c4] ss:$16 sps:$4 sm:$0xff]   ;;  %v3827_v27 = vld [vmem:[#allocation5 + $0x2cc] ss:$16 sps:$4 sm:$0xff]  }
  0x6a   :  { %1509 = vmatprep.subr.bf16.mxu0 %v3735_v32  ;;  %1681 = vmatprep.subr.bf16.mxu1 %v3737_v33  ;;  %v3822_v28 = vld [vmem:[#allocation5 + $0x2c0] ss:$16 sps:$4 sm:$0xff]   ;;  %v3825_v29 = vld [vmem:[#allocation5 + $0x2c8] ss:$16 sps:$4 sm:$0xff]   ;;  %v3830_v31 = vld [vmem:[#allocation5 + $0x2e4] ss:$16 sps:$4 sm:$0xff]  }
  0x6b   :  { %v3884_v30 = vld [vmem:[#allocation2 + $0xc] ss:$28 sps:$4 sm:$0xff]   ;;  %v3833_v32 = vld [vmem:[#allocation5 + $0x2ec] ss:$16 sps:$4 sm:$0xff]   ;;  %s4386_s8 = smov [#allocation10]  }
  0x6c   :  { %v3828_v33 = vld [vmem:[#allocation5 + $0x2e0] ss:$16 sps:$4 sm:$0xff]   ;;  %v3857_v48 = vld [vmem:[#allocation5 + $0x36c] ss:$16 sps:$4 sm:$0xff]   ;;  %s3175_s9 = sshll.u32 %s4386_s8, 4  ;;  %s3176_s9 = int_to_ptr.vmem [resolvable:$true] %s3175_s9 }
  0x6d   :  { %1510 = vmatpush1.bf16.msra.mxu0 %v3739_v34  ;;  %1682 = vmatpush1.bf16.msra.mxu1 %v3740_v35  ;;  %v3831_v34 = vld [vmem:[#allocation5 + $0x2e8] ss:$16 sps:$4 sm:$0xff]   ;;  %v3836_v35 = vld [vmem:[#allocation5 + $0x304] ss:$16 sps:$4 sm:$0xff]   ;;  %p4350_p5 = scmp.lt.s32.totalorder %s3176_s9, %s3176_s9 }
  0x6e   :  { %1511 = vmatprep.subr.bf16.mxu0 %v3741_v36  ;;  %1683 = vmatprep.subr.bf16.mxu1 %v3743_v37  ;;  %v3839_v36 = vld [vmem:[#allocation5 + $0x30c] ss:$16 sps:$4 sm:$0xff]   ;;  %v3834_v37 = vld [vmem:[#allocation5 + $0x300] ss:$16 sps:$4 sm:$0xff]  }
  0x71   :  { %1512 = vmatpush1.bf16.msra.mxu0 %v3745_v38  ;;  %1684 = vmatpush1.bf16.msra.mxu1 %v3746_v39  ;;  %v3837_v38 = vld [vmem:[#allocation5 + $0x308] ss:$16 sps:$4 sm:$0xff]   ;;  %v3842_v39 = vld [vmem:[#allocation5 + $0x324] ss:$16 sps:$4 sm:$0xff]  }
  0x72   :  { %1513 = vmatprep.subr.bf16.mxu0 %v3747_v40  ;;  %1685 = vmatprep.subr.bf16.mxu1 %v3749_v41  ;;  %v3845_v40 = vld [vmem:[#allocation5 + $0x32c] ss:$16 sps:$4 sm:$0xff]   ;;  %v3840_v41 = vld [vmem:[#allocation5 + $0x320] ss:$16 sps:$4 sm:$0xff]  }
  0x75   :  { %1514 = vmatpush1.bf16.msra.mxu0 %v3751_v42  ;;  %1686 = vmatpush1.bf16.msra.mxu1 %v3752_v43  ;;  %v3843_v42 = vld [vmem:[#allocation5 + $0x328] ss:$16 sps:$4 sm:$0xff]   ;;  %v3848_v43 = vld [vmem:[#allocation5 + $0x344] ss:$16 sps:$4 sm:$0xff]  }
  0x76   :  { %1515 = vmatprep.subr.bf16.mxu0 %v3753_v44  ;;  %1687 = vmatprep.subr.bf16.mxu1 %v3755_v45  ;;  %v3851_v44 = vld [vmem:[#allocation5 + $0x34c] ss:$16 sps:$4 sm:$0xff]   ;;  %v3846_v45 = vld [vmem:[#allocation5 + $0x340] ss:$16 sps:$4 sm:$0xff]  }
  0x79   :  { %1516 = vmatpush1.bf16.msra.mxu0 %v3757_v46  ;;  %1688 = vmatpush1.bf16.msra.mxu1 %v3758_v47  ;;  %v3849_v46 = vld [vmem:[#allocation5 + $0x348] ss:$16 sps:$4 sm:$0xff]   ;;  %v3854_v47 = vld [vmem:[#allocation5 + $0x364] ss:$16 sps:$4 sm:$0xff]  }
  0x7a   :  { %1517 = vmatprep.subr.bf16.mxu0 %v3759_v49  ;;  %1689 = vmatprep.subr.bf16.mxu1 %v3761_v50  ;;  %v3852_v49 = vld [vmem:[#allocation5 + $0x360] ss:$16 sps:$4 sm:$0xff]   ;;  %v3855_v50 = vld [vmem:[#allocation5 + $0x368] ss:$16 sps:$4 sm:$0xff]  }
  0x7d   :  { %1518 = vmatpush1.bf16.msra.mxu0 %v3763_v51  ;;  %1690 = vmatpush1.bf16.msra.mxu1 %v3764_v52  ;;  %v3860_v51 = vld [vmem:[#allocation5 + $0x384] ss:$16 sps:$4 sm:$0xff]   ;;  %v3863_v52 = vld [vmem:[#allocation5 + $0x38c] ss:$16 sps:$4 sm:$0xff]  }
  0x7e   :  { %1519 = vmatprep.subr.bf16.mxu0 %v3765_v53  ;;  %1691 = vmatprep.subr.bf16.mxu1 %v3767_v54  ;;  %v3858_v53 = vld [vmem:[#allocation5 + $0x380] ss:$16 sps:$4 sm:$0xff]   ;;  %v3861_v54 = vld [vmem:[#allocation5 + $0x388] ss:$16 sps:$4 sm:$0xff]  }
  0x81   :  { %1520 = vmatpush1.bf16.msra.mxu0 %v3769_v55  ;;  %1692 = vmatpush1.bf16.msra.mxu1 %v3770_v56  ;;  %v3866_v55 = vld [vmem:[#allocation5 + $0x3a4] ss:$16 sps:$4 sm:$0xff]   ;;  %v3869_v56 = vld [vmem:[#allocation5 + $0x3ac] ss:$16 sps:$4 sm:$0xff]  }
  0x82   :  { %1521 = vmatprep.subr.bf16.mxu0 %v3771_v57  ;;  %1693 = vmatprep.subr.bf16.mxu1 %v3773_v58  ;;  %v3864_v57 = vld [vmem:[#allocation5 + $0x3a0] ss:$16 sps:$4 sm:$0xff]   ;;  %v3867_v58 = vld [vmem:[#allocation5 + $0x3a8] ss:$16 sps:$4 sm:$0xff]  }
  0x85   :  { %1522 = vmatpush1.bf16.msra.mxu0 %v3775_v59  ;;  %1694 = vmatpush1.bf16.msra.mxu1 %v3776_v60  ;;  %v3872_v59 = vld [vmem:[#allocation5 + $0x3c4] ss:$16 sps:$4 sm:$0xff]   ;;  %v3875_v60 = vld [vmem:[#allocation5 + $0x3cc] ss:$16 sps:$4 sm:$0xff]  }
  0x86   :  { %1523 = vmatprep.subr.bf16.mxu0 %v3777_v61  ;;  %1695 = vmatprep.subr.bf16.mxu1 %v3779_v62  ;;  %v3870_v61 = vld [vmem:[#allocation5 + $0x3c0] ss:$16 sps:$4 sm:$0xff]   ;;  %v3873_v62 = vld [vmem:[#allocation5 + $0x3c8] ss:$16 sps:$4 sm:$0xff]  }
  0x89   :  { %1524 = vmatpush1.bf16.msra.mxu0 %v3781_v63  ;;  %1696 = vmatpush1.bf16.msra.mxu1 %v3782_v0  ;;  %v3878_v63 = vld [vmem:[#allocation5 + $0x3e4] ss:$16 sps:$4 sm:$0xff]   ;;  %v3881_v0 = vld [vmem:[#allocation5 + $0x3ec] ss:$16 sps:$4 sm:$0xff]  }
  0x8a   :  { %1536 = vmatprep.subr.bf16.mxu0 %v3788_v1  ;;  %1708 = vmatprep.subr.bf16.mxu1 %v3791_v2  ;;  %v3876_v1 = vld [vmem:[#allocation5 + $0x3e0] ss:$16 sps:$4 sm:$0xff]   ;;  %v3879_v2 = vld [vmem:[#allocation5 + $0x3e8] ss:$16 sps:$4 sm:$0xff]  }
  0x8c   :  { %1526 = vmatmul.mubr.bf16.vlgmr.msra.gmra.mrb[0].mxu0 %v3783_v3  ;;  %1698 = vmatmul.mubr.bf16.vlgmr.msra.gmra.mrb[0].mxu1 %v3783_v3  ;;  %v3887_v3 = vld [vmem:[#allocation5 + $0x404] ss:$16 sps:$4 sm:$0xff]  }
  0x8d   :  { %1537 = vmatpush1.bf16.msra.mxu0 %v3786_v4  ;;  %1709 = vmatpush1.bf16.msra.mxu1 %v3789_v5  ;;  %v3890_v4 = vld [vmem:[#allocation5 + $0x40c] ss:$16 sps:$4 sm:$0xff]  }
  0x8e   :  { %1538 = vmatprep.subr.bf16.mxu0 %v3794_v6  ;;  %1710 = vmatprep.subr.bf16.mxu1 %v3797_v7  ;;  %v3882_v5 = vld [vmem:[#allocation2 + $0x8] ss:$28 sps:$4 sm:$0xff]   ;;  %v3888_v7 = vld [vmem:[#allocation5 + $0x408] ss:$16 sps:$4 sm:$0xff]  }
  0x8f   :  { %1568 = vmatprep.mubr.bf16.mxu0 %v3884_v30  ;;  %1740 = vmatprep.mubr.bf16.mxu1 %v3884_v30  ;;  %v3885_v6 = vld [vmem:[#allocation5 + $0x400] ss:$16 sps:$4 sm:$0xff]   ;;  %v3926_v30 = vld [vmem:[#allocation5 + $0x4cc] ss:$16 sps:$4 sm:$0xff]  }
  0x91   :  { %1539 = vmatpush1.bf16.msra.mxu0 %v3792_v8  ;;  %1711 = vmatpush1.bf16.msra.mxu1 %v3795_v9  ;;  %v3893_v8 = vld [vmem:[#allocation5 + $0x424] ss:$16 sps:$4 sm:$0xff]   ;;  %v3896_v9 = vld [vmem:[#allocation5 + $0x42c] ss:$16 sps:$4 sm:$0xff]  }
  0x92   :  { %1540 = vmatprep.subr.bf16.mxu0 %v3800_v10  ;;  %1712 = vmatprep.subr.bf16.mxu1 %v3803_v11  ;;  %v3891_v10 = vld [vmem:[#allocation5 + $0x420] ss:$16 sps:$4 sm:$0xff]   ;;  %v3894_v11 = vld [vmem:[#allocation5 + $0x428] ss:$16 sps:$4 sm:$0xff]  }
  0x95   :  { %1541 = vmatpush1.bf16.msra.mxu0 %v3798_v12  ;;  %1713 = vmatpush1.bf16.msra.mxu1 %v3801_v13  ;;  %v3983_v12 = vld [vmem:[#allocation2 + $0x14] ss:$28 sps:$4 sm:$0xff]   ;;  %v3899_v13 = vld [vmem:[#allocation5 + $0x444] ss:$16 sps:$4 sm:$0xff]  }
  0x96   :  { %1542 = vmatprep.subr.bf16.mxu0 %v3806_v14  ;;  %1714 = vmatprep.subr.bf16.mxu1 %v3809_v15  ;;  %v3902_v14 = vld [vmem:[#allocation5 + $0x44c] ss:$16 sps:$4 sm:$0xff]   ;;  %v3897_v15 = vld [vmem:[#allocation5 + $0x440] ss:$16 sps:$4 sm:$0xff]  }
  0x99   :  { %1543 = vmatpush1.bf16.msra.mxu0 %v3804_v16  ;;  %1715 = vmatpush1.bf16.msra.mxu1 %v3807_v17  ;;  %v3900_v16 = vld [vmem:[#allocation5 + $0x448] ss:$16 sps:$4 sm:$0xff]   ;;  %v3905_v17 = vld [vmem:[#allocation5 + $0x464] ss:$16 sps:$4 sm:$0xff]  }
  0x9a   :  { %1544 = vmatprep.subr.bf16.mxu0 %v3812_v18  ;;  %1716 = vmatprep.subr.bf16.mxu1 %v3815_v19  ;;  %v3908_v18 = vld [vmem:[#allocation5 + $0x46c] ss:$16 sps:$4 sm:$0xff]   ;;  %v3903_v19 = vld [vmem:[#allocation5 + $0x460] ss:$16 sps:$4 sm:$0xff]  }
  0x9d   :  { %1545 = vmatpush1.bf16.msra.mxu0 %v3810_v20  ;;  %1717 = vmatpush1.bf16.msra.mxu1 %v3813_v21  ;;  %v3906_v20 = vld [vmem:[#allocation5 + $0x468] ss:$16 sps:$4 sm:$0xff]   ;;  %v3911_v21 = vld [vmem:[#allocation5 + $0x484] ss:$16 sps:$4 sm:$0xff]  }
  0x9e   :  { %1546 = vmatprep.subr.bf16.mxu0 %v3818_v22  ;;  %1718 = vmatprep.subr.bf16.mxu1 %v3821_v23  ;;  %v3914_v22 = vld [vmem:[#allocation5 + $0x48c] ss:$16 sps:$4 sm:$0xff]   ;;  %v3909_v23 = vld [vmem:[#allocation5 + $0x480] ss:$16 sps:$4 sm:$0xff]  }
  0xa1   :  { %1547 = vmatpush1.bf16.msra.mxu0 %v3816_v24  ;;  %1719 = vmatpush1.bf16.msra.mxu1 %v3819_v25  ;;  %v3912_v24 = vld [vmem:[#allocation5 + $0x488] ss:$16 sps:$4 sm:$0xff]   ;;  %v3917_v25 = vld [vmem:[#allocation5 + $0x4a4] ss:$16 sps:$4 sm:$0xff]  }
  0xa2   :  { %1548 = vmatprep.subr.bf16.mxu0 %v3824_v26  ;;  %1720 = vmatprep.subr.bf16.mxu1 %v3827_v27  ;;  %v3920_v26 = vld [vmem:[#allocation5 + $0x4ac] ss:$16 sps:$4 sm:$0xff]   ;;  %v3915_v27 = vld [vmem:[#allocation5 + $0x4a0] ss:$16 sps:$4 sm:$0xff]  }
  0xa5   :  { %1549 = vmatpush1.bf16.msra.mxu0 %v3822_v28  ;;  %1721 = vmatpush1.bf16.msra.mxu1 %v3825_v29  ;;  %v3918_v28 = vld [vmem:[#allocation5 + $0x4a8] ss:$16 sps:$4 sm:$0xff]   ;;  %v3923_v29 = vld [vmem:[#allocation5 + $0x4c4] ss:$16 sps:$4 sm:$0xff]  }
  0xa6   :  { %1550 = vmatprep.subr.bf16.mxu0 %v3830_v31  ;;  %1722 = vmatprep.subr.bf16.mxu1 %v3833_v32  ;;  %v3921_v31 = vld [vmem:[#allocation5 + $0x4c0] ss:$16 sps:$4 sm:$0xff]   ;;  %v3924_v32 = vld [vmem:[#allocation5 + $0x4c8] ss:$16 sps:$4 sm:$0xff]  }
  0xa9   :  { %1551 = vmatpush1.bf16.msra.mxu0 %v3828_v33  ;;  %1723 = vmatpush1.bf16.msra.mxu1 %v3831_v34  ;;  %v3929_v33 = vld [vmem:[#allocation5 + $0x4e4] ss:$16 sps:$4 sm:$0xff]   ;;  %v3932_v34 = vld [vmem:[#allocation5 + $0x4ec] ss:$16 sps:$4 sm:$0xff]  }
  0xaa   :  { %1552 = vmatprep.subr.bf16.mxu0 %v3836_v35  ;;  %1724 = vmatprep.subr.bf16.mxu1 %v3839_v36  ;;  %v3927_v35 = vld [vmem:[#allocation5 + $0x4e0] ss:$16 sps:$4 sm:$0xff]   ;;  %v3930_v36 = vld [vmem:[#allocation5 + $0x4e8] ss:$16 sps:$4 sm:$0xff]  }
  0xad   :  { %1553 = vmatpush1.bf16.msra.mxu0 %v3834_v37  ;;  %1725 = vmatpush1.bf16.msra.mxu1 %v3837_v38  ;;  %v3935_v37 = vld [vmem:[#allocation5 + $0x504] ss:$16 sps:$4 sm:$0xff]   ;;  %v3938_v38 = vld [vmem:[#allocation5 + $0x50c] ss:$16 sps:$4 sm:$0xff]  }
  0xae   :  { %1554 = vmatprep.subr.bf16.mxu0 %v3842_v39  ;;  %1726 = vmatprep.subr.bf16.mxu1 %v3845_v40  ;;  %v3933_v39 = vld [vmem:[#allocation5 + $0x500] ss:$16 sps:$4 sm:$0xff]   ;;  %v3936_v40 = vld [vmem:[#allocation5 + $0x508] ss:$16 sps:$4 sm:$0xff]  }
  0xb1   :  { %1555 = vmatpush1.bf16.msra.mxu0 %v3840_v41  ;;  %1727 = vmatpush1.bf16.msra.mxu1 %v3843_v42  ;;  %v3941_v41 = vld [vmem:[#allocation5 + $0x524] ss:$16 sps:$4 sm:$0xff]   ;;  %v3944_v42 = vld [vmem:[#allocation5 + $0x52c] ss:$16 sps:$4 sm:$0xff]  }
  0xb2   :  { %1556 = vmatprep.subr.bf16.mxu0 %v3848_v43  ;;  %1728 = vmatprep.subr.bf16.mxu1 %v3851_v44  ;;  %v3939_v43 = vld [vmem:[#allocation5 + $0x520] ss:$16 sps:$4 sm:$0xff]   ;;  %v3942_v44 = vld [vmem:[#allocation5 + $0x528] ss:$16 sps:$4 sm:$0xff]  }
  0xb5   :  { %1557 = vmatpush1.bf16.msra.mxu0 %v3846_v45  ;;  %1729 = vmatpush1.bf16.msra.mxu1 %v3849_v46  ;;  %v3947_v45 = vld [vmem:[#allocation5 + $0x544] ss:$16 sps:$4 sm:$0xff]   ;;  %v3950_v46 = vld [vmem:[#allocation5 + $0x54c] ss:$16 sps:$4 sm:$0xff]  }
  0xb6   :  { %1558 = vmatprep.subr.bf16.mxu0 %v3854_v47  ;;  %1730 = vmatprep.subr.bf16.mxu1 %v3857_v48  ;;  %v3945_v47 = vld [vmem:[#allocation5 + $0x540] ss:$16 sps:$4 sm:$0xff]   ;;  %v3948_v48 = vld [vmem:[#allocation5 + $0x548] ss:$16 sps:$4 sm:$0xff]  }
  0xb9   :  { %1559 = vmatpush1.bf16.msra.mxu0 %v3852_v49  ;;  %1731 = vmatpush1.bf16.msra.mxu1 %v3855_v50  ;;  %v3953_v49 = vld [vmem:[#allocation5 + $0x564] ss:$16 sps:$4 sm:$0xff]   ;;  %v3956_v50 = vld [vmem:[#allocation5 + $0x56c] ss:$16 sps:$4 sm:$0xff]  }
  0xba   :  { %1560 = vmatprep.subr.bf16.mxu0 %v3860_v51  ;;  %1732 = vmatprep.subr.bf16.mxu1 %v3863_v52  ;;  %v3951_v51 = vld [vmem:[#allocation5 + $0x560] ss:$16 sps:$4 sm:$0xff]   ;;  %v3954_v52 = vld [vmem:[#allocation5 + $0x568] ss:$16 sps:$4 sm:$0xff]  }
  0xbd   :  { %1561 = vmatpush1.bf16.msra.mxu0 %v3858_v53  ;;  %1733 = vmatpush1.bf16.msra.mxu1 %v3861_v54  ;;  %v3959_v53 = vld [vmem:[#allocation5 + $0x584] ss:$16 sps:$4 sm:$0xff]   ;;  %v3962_v54 = vld [vmem:[#allocation5 + $0x58c] ss:$16 sps:$4 sm:$0xff]  }
  0xbe   :  { %1562 = vmatprep.subr.bf16.mxu0 %v3866_v55  ;;  %1734 = vmatprep.subr.bf16.mxu1 %v3869_v56  ;;  %v3957_v55 = vld [vmem:[#allocation5 + $0x580] ss:$16 sps:$4 sm:$0xff]   ;;  %v3960_v56 = vld [vmem:[#allocation5 + $0x588] ss:$16 sps:$4 sm:$0xff]  }
  0xc1   :  { %1563 = vmatpush1.bf16.msra.mxu0 %v3864_v57  ;;  %1735 = vmatpush1.bf16.msra.mxu1 %v3867_v58  ;;  %v3965_v57 = vld [vmem:[#allocation5 + $0x5a4] ss:$16 sps:$4 sm:$0xff]   ;;  %v3968_v58 = vld [vmem:[#allocation5 + $0x5ac] ss:$16 sps:$4 sm:$0xff]  }
  0xc2   :  { %1564 = vmatprep.subr.bf16.mxu0 %v3872_v59  ;;  %1736 = vmatprep.subr.bf16.mxu1 %v3875_v60  ;;  %v3963_v59 = vld [vmem:[#allocation5 + $0x5a0] ss:$16 sps:$4 sm:$0xff]   ;;  %v3966_v60 = vld [vmem:[#allocation5 + $0x5a8] ss:$16 sps:$4 sm:$0xff]  }
  0xc5   :  { %1565 = vmatpush1.bf16.msra.mxu0 %v3870_v61  ;;  %1737 = vmatpush1.bf16.msra.mxu1 %v3873_v62  ;;  %v3971_v61 = vld [vmem:[#allocation5 + $0x5c4] ss:$16 sps:$4 sm:$0xff]   ;;  %v3974_v62 = vld [vmem:[#allocation5 + $0x5cc] ss:$16 sps:$4 sm:$0xff]  }
  0xc6   :  { %1566 = vmatprep.subr.bf16.mxu0 %v3878_v63  ;;  %1738 = vmatprep.subr.bf16.mxu1 %v3881_v0  ;;  %v3969_v63 = vld [vmem:[#allocation5 + $0x5c0] ss:$16 sps:$4 sm:$0xff]   ;;  %v3972_v0 = vld [vmem:[#allocation5 + $0x5c8] ss:$16 sps:$4 sm:$0xff]  }
  0xc9   :  { %1567 = vmatpush1.bf16.msra.mxu0 %v3876_v1  ;;  %1739 = vmatpush1.bf16.msra.mxu1 %v3879_v2  ;;  %v3977_v1 = vld [vmem:[#allocation5 + $0x5e4] ss:$16 sps:$4 sm:$0xff]   ;;  %v3980_v2 = vld [vmem:[#allocation5 + $0x5ec] ss:$16 sps:$4 sm:$0xff]  }
  0xca   :  { %1579 = vmatprep.subr.bf16.mxu0 %v3887_v3  ;;  %1751 = vmatprep.subr.bf16.mxu1 %v3890_v4  ;;  %v3975_v3 = vld [vmem:[#allocation5 + $0x5e0] ss:$16 sps:$4 sm:$0xff]   ;;  %v3978_v4 = vld [vmem:[#allocation5 + $0x5e8] ss:$16 sps:$4 sm:$0xff]  }
  0xcc   :  { %1569 = vmatmul.mubr.bf16.vlgmr.msra.gmra.mrb[0].mxu0 %v3882_v5  ;;  %1741 = vmatmul.mubr.bf16.vlgmr.msra.gmra.mrb[0].mxu1 %v3882_v5  ;;  %v3986_v5 = vld [vmem:[#allocation5 + $0x604] ss:$16 sps:$4 sm:$0xff]  }
  0xcd   :  { %1580 = vmatpush1.bf16.msra.mxu0 %v3885_v6  ;;  %1752 = vmatpush1.bf16.msra.mxu1 %v3888_v7  ;;  %v3981_v6 = vld [vmem:[#allocation2 + $0x10] ss:$28 sps:$4 sm:$0xff]   ;;  %v3989_v7 = vld [vmem:[#allocation5 + $0x60c] ss:$16 sps:$4 sm:$0xff]  }
  0xce   :  { %1581 = vmatprep.subr.bf16.mxu0 %v3893_v8  ;;  %1753 = vmatprep.subr.bf16.mxu1 %v3896_v9  ;;  %v3984_v8 = vld [vmem:[#allocation5 + $0x600] ss:$16 sps:$4 sm:$0xff]   ;;  %v3987_v9 = vld [vmem:[#allocation5 + $0x608] ss:$16 sps:$4 sm:$0xff]  }
  0xcf   :  { %1611 = vmatprep.mubr.bf16.mxu0 %v3983_v12  ;;  %1783 = vmatprep.mubr.bf16.mxu1 %v3983_v12  ;;  %v3990_v12 = vld [vmem:[#allocation5 + $0x620] ss:$16 sps:$4 sm:$0xff]  }
  0xd1   :  { %1582 = vmatpush1.bf16.msra.mxu0 %v3891_v10  ;;  %1754 = vmatpush1.bf16.msra.mxu1 %v3894_v11  ;;  %v3992_v10 = vld [vmem:[#allocation5 + $0x624] ss:$16 sps:$4 sm:$0xff]   ;;  %v3995_v11 = vld [vmem:[#allocation5 + $0x62c] ss:$16 sps:$4 sm:$0xff]  }
  0xd2   :  { %1583 = vmatprep.subr.bf16.mxu0 %v3899_v13  ;;  %1755 = vmatprep.subr.bf16.mxu1 %v3902_v14  ;;  %v3993_v13 = vld [vmem:[#allocation5 + $0x628] ss:$16 sps:$4 sm:$0xff]   ;;  %v3998_v14 = vld [vmem:[#allocation5 + $0x644] ss:$16 sps:$4 sm:$0xff]  }
  0xd5   :  { %1584 = vmatpush1.bf16.msra.mxu0 %v3897_v15  ;;  %1756 = vmatpush1.bf16.msra.mxu1 %v3900_v16  ;;  %v4001_v15 = vld [vmem:[#allocation5 + $0x64c] ss:$16 sps:$4 sm:$0xff]   ;;  %v3996_v16 = vld [vmem:[#allocation5 + $0x640] ss:$16 sps:$4 sm:$0xff]  }
  0xd6   :  { %1585 = vmatprep.subr.bf16.mxu0 %v3905_v17  ;;  %1757 = vmatprep.subr.bf16.mxu1 %v3908_v18  ;;  %v3999_v17 = vld [vmem:[#allocation5 + $0x648] ss:$16 sps:$4 sm:$0xff]   ;;  %v4385_v18 = vmov 0  }
  0xd9   :  { %1586 = vmatpush1.bf16.msra.mxu0 %v3903_v19  ;;  %1758 = vmatpush1.bf16.msra.mxu1 %v3906_v20  ;;  %v4004_v19 = vld [vmem:[#allocation5 + $0x664] ss:$16 sps:$4 sm:$0xff]   ;;  %v4007_v20 = vld [vmem:[#allocation5 + $0x66c] ss:$16 sps:$4 sm:$0xff]  }
  0xda   :  { %1587 = vmatprep.subr.bf16.mxu0 %v3911_v21  ;;  %1759 = vmatprep.subr.bf16.mxu1 %v3914_v22  ;;  %v4002_v21 = vld [vmem:[#allocation5 + $0x660] ss:$16 sps:$4 sm:$0xff]   ;;  %v4005_v22 = vld [vmem:[#allocation5 + $0x668] ss:$16 sps:$4 sm:$0xff]  }
  0xdd   :  { %1588 = vmatpush1.bf16.msra.mxu0 %v3909_v23  ;;  %1760 = vmatpush1.bf16.msra.mxu1 %v3912_v24  ;;  %v4010_v23 = vld [vmem:[#allocation5 + $0x684] ss:$16 sps:$4 sm:$0xff]   ;;  %v4013_v24 = vld [vmem:[#allocation5 + $0x68c] ss:$16 sps:$4 sm:$0xff]  }
  0xde   :  { %1589 = vmatprep.subr.bf16.mxu0 %v3917_v25  ;;  %1761 = vmatprep.subr.bf16.mxu1 %v3920_v26  ;;  %v4008_v25 = vld [vmem:[#allocation5 + $0x680] ss:$16 sps:$4 sm:$0xff]   ;;  %v4011_v26 = vld [vmem:[#allocation5 + $0x688] ss:$16 sps:$4 sm:$0xff]  }
  0xe1   :  { %1590 = vmatpush1.bf16.msra.mxu0 %v3915_v27  ;;  %1762 = vmatpush1.bf16.msra.mxu1 %v3918_v28  ;;  %v4016_v27 = vld [vmem:[#allocation5 + $0x6a4] ss:$16 sps:$4 sm:$0xff]   ;;  %v4019_v28 = vld [vmem:[#allocation5 + $0x6ac] ss:$16 sps:$4 sm:$0xff]  }
  0xe2   :  { %1591 = vmatprep.subr.bf16.mxu0 %v3923_v29  ;;  %1763 = vmatprep.subr.bf16.mxu1 %v3926_v30  ;;  %v4014_v29 = vld [vmem:[#allocation5 + $0x6a0] ss:$16 sps:$4 sm:$0xff]   ;;  %v4017_v30 = vld [vmem:[#allocation5 + $0x6a8] ss:$16 sps:$4 sm:$0xff]  }
  0xe5   :  { %1592 = vmatpush1.bf16.msra.mxu0 %v3921_v31  ;;  %1764 = vmatpush1.bf16.msra.mxu1 %v3924_v32  ;;  %v4022_v31 = vld [vmem:[#allocation5 + $0x6c4] ss:$16 sps:$4 sm:$0xff]   ;;  %v4025_v32 = vld [vmem:[#allocation5 + $0x6cc] ss:$16 sps:$4 sm:$0xff]  }
  0xe6   :  { %1593 = vmatprep.subr.bf16.mxu0 %v3929_v33  ;;  %1765 = vmatprep.subr.bf16.mxu1 %v3932_v34  ;;  %v4020_v33 = vld [vmem:[#allocation5 + $0x6c0] ss:$16 sps:$4 sm:$0xff]   ;;  %v4023_v34 = vld [vmem:[#allocation5 + $0x6c8] ss:$16 sps:$4 sm:$0xff]  }
  0xe9   :  { %1594 = vmatpush1.bf16.msra.mxu0 %v3927_v35  ;;  %1766 = vmatpush1.bf16.msra.mxu1 %v3930_v36  ;;  %v4028_v35 = vld [vmem:[#allocation5 + $0x6e4] ss:$16 sps:$4 sm:$0xff]   ;;  %v4031_v36 = vld [vmem:[#allocation5 + $0x6ec] ss:$16 sps:$4 sm:$0xff]  }
  0xea   :  { %1595 = vmatprep.subr.bf16.mxu0 %v3935_v37  ;;  %1767 = vmatprep.subr.bf16.mxu1 %v3938_v38  ;;  %v4026_v37 = vld [vmem:[#allocation5 + $0x6e0] ss:$16 sps:$4 sm:$0xff]   ;;  %v4029_v38 = vld [vmem:[#allocation5 + $0x6e8] ss:$16 sps:$4 sm:$0xff]  }
  0xed   :  { %1596 = vmatpush1.bf16.msra.mxu0 %v3933_v39  ;;  %1768 = vmatpush1.bf16.msra.mxu1 %v3936_v40  ;;  %v4035_v39 = vld [vmem:[#allocation7 + $0x4] ss:$16 sps:$4 sm:$0xff]   ;;  %v4038_v40 = vld [vmem:[#allocation7 + $0xc] ss:$16 sps:$4 sm:$0xff]  }
  0xee   :  { %1597 = vmatprep.subr.bf16.mxu0 %v3941_v41  ;;  %1769 = vmatprep.subr.bf16.mxu1 %v3944_v42  ;;  %v4032_v41 = vld [vmem:[#allocation2 + $0x18] ss:$28 sps:$4 sm:$0xff]  }
  0xef   :  { %v4033_v42 = vld [vmem:[#allocation7] ss:$16 sps:$4 sm:$0xff]  }
  0xf1   :  { %1598 = vmatpush1.bf16.msra.mxu0 %v3939_v43  ;;  %1770 = vmatpush1.bf16.msra.mxu1 %v3942_v44  ;;  %v4036_v43 = vld [vmem:[#allocation7 + $0x8] ss:$16 sps:$4 sm:$0xff]   ;;  %v4041_v44 = vld [vmem:[#allocation7 + $0x24] ss:$16 sps:$4 sm:$0xff]  }
  0xf2   :  { %1599 = vmatprep.subr.bf16.mxu0 %v3947_v45  ;;  %1771 = vmatprep.subr.bf16.mxu1 %v3950_v46  ;;  %v4044_v45 = vld [vmem:[#allocation7 + $0x2c] ss:$16 sps:$4 sm:$0xff]   ;;  %v4039_v46 = vld [vmem:[#allocation7 + $0x20] ss:$16 sps:$4 sm:$0xff]  }
  0xf5   :  { %1600 = vmatpush1.bf16.msra.mxu0 %v3945_v47  ;;  %1772 = vmatpush1.bf16.msra.mxu1 %v3948_v48  ;;  %v4042_v47 = vld [vmem:[#allocation7 + $0x28] ss:$16 sps:$4 sm:$0xff]   ;;  %v4047_v48 = vld [vmem:[#allocation7 + $0x44] ss:$16 sps:$4 sm:$0xff]  }
  0xf6   :  { %1601 = vmatprep.subr.bf16.mxu0 %v3953_v49  ;;  %1773 = vmatprep.subr.bf16.mxu1 %v3956_v50  ;;  %v4050_v49 = vld [vmem:[#allocation7 + $0x4c] ss:$16 sps:$4 sm:$0xff]   ;;  %v4045_v50 = vld [vmem:[#allocation7 + $0x40] ss:$16 sps:$4 sm:$0xff]  }
  0xf9   :  { %1602 = vmatpush1.bf16.msra.mxu0 %v3951_v51  ;;  %1774 = vmatpush1.bf16.msra.mxu1 %v3954_v52  ;;  %v4048_v51 = vld [vmem:[#allocation7 + $0x48] ss:$16 sps:$4 sm:$0xff]   ;;  %v4053_v52 = vld [vmem:[#allocation7 + $0x64] ss:$16 sps:$4 sm:$0xff]  }
  0xfa   :  { %1603 = vmatprep.subr.bf16.mxu0 %v3959_v53  ;;  %1775 = vmatprep.subr.bf16.mxu1 %v3962_v54  ;;  %v4056_v53 = vld [vmem:[#allocation7 + $0x6c] ss:$16 sps:$4 sm:$0xff]   ;;  %v4051_v54 = vld [vmem:[#allocation7 + $0x60] ss:$16 sps:$4 sm:$0xff]  }
  0xfd   :  { %1604 = vmatpush1.bf16.msra.mxu0 %v3957_v55  ;;  %1776 = vmatpush1.bf16.msra.mxu1 %v3960_v56  ;;  %v4054_v55 = vld [vmem:[#allocation7 + $0x68] ss:$16 sps:$4 sm:$0xff]   ;;  %v4059_v56 = vld [vmem:[#allocation7 + $0x84] ss:$16 sps:$4 sm:$0xff]  }
  0xfe   :  { %1605 = vmatprep.subr.bf16.mxu0 %v3965_v57  ;;  %1777 = vmatprep.subr.bf16.mxu1 %v3968_v58  ;;  %v4062_v57 = vld [vmem:[#allocation7 + $0x8c] ss:$16 sps:$4 sm:$0xff]   ;;  %v4057_v58 = vld [vmem:[#allocation7 + $0x80] ss:$16 sps:$4 sm:$0xff]  }
 0x101   :  { %1606 = vmatpush1.bf16.msra.mxu0 %v3963_v59  ;;  %1778 = vmatpush1.bf16.msra.mxu1 %v3966_v60  ;;  %v4060_v59 = vld [vmem:[#allocation7 + $0x88] ss:$16 sps:$4 sm:$0xff]   ;;  %v4065_v60 = vld [vmem:[#allocation7 + $0xa4] ss:$16 sps:$4 sm:$0xff]  }
 0x102   :  { %1607 = vmatprep.subr.bf16.mxu0 %v3971_v61  ;;  %1779 = vmatprep.subr.bf16.mxu1 %v3974_v62  ;;  %v4068_v61 = vld [vmem:[#allocation7 + $0xac] ss:$16 sps:$4 sm:$0xff]   ;;  %v4063_v62 = vld [vmem:[#allocation7 + $0xa0] ss:$16 sps:$4 sm:$0xff]  }
 0x105   :  { %1608 = vmatpush1.bf16.msra.mxu0 %v3969_v63  ;;  %1780 = vmatpush1.bf16.msra.mxu1 %v3972_v0  ;;  %v4066_v63 = vld [vmem:[#allocation7 + $0xa8] ss:$16 sps:$4 sm:$0xff]   ;;  %v4071_v0 = vld [vmem:[#allocation7 + $0xc4] ss:$16 sps:$4 sm:$0xff]  }
 0x106   :  { %1609 = vmatprep.subr.bf16.mxu0 %v3977_v1  ;;  %1781 = vmatprep.subr.bf16.mxu1 %v3980_v2  ;;  %v4074_v1 = vld [vmem:[#allocation7 + $0xcc] ss:$16 sps:$4 sm:$0xff]   ;;  %v4069_v2 = vld [vmem:[#allocation7 + $0xc0] ss:$16 sps:$4 sm:$0xff]  }
 0x109   :  { %1610 = vmatpush1.bf16.msra.mxu0 %v3975_v3  ;;  %1782 = vmatpush1.bf16.msra.mxu1 %v3978_v4  ;;  %v4072_v3 = vld [vmem:[#allocation7 + $0xc8] ss:$16 sps:$4 sm:$0xff]   ;;  %v4077_v4 = vld [vmem:[#allocation7 + $0xe4] ss:$16 sps:$4 sm:$0xff]  }
 0x10a   :  { %1622 = vmatprep.subr.bf16.mxu0 %v3986_v5  ;;  %1794 = vmatprep.subr.bf16.mxu1 %v3989_v7  ;;  %v4080_v5 = vld [vmem:[#allocation7 + $0xec] ss:$16 sps:$4 sm:$0xff]   ;;  %v4078_v7 = vld [vmem:[#allocation7 + $0xe8] ss:$16 sps:$4 sm:$0xff]  }
 0x10c   :  { %1612 = vmatmul.mubr.bf16.vlgmr.msra.gmra.mrb[0].mxu0 %v3981_v6  ;;  %1784 = vmatmul.mubr.bf16.vlgmr.msra.gmra.mrb[0].mxu1 %v3981_v6  ;;  %v4075_v6 = vld [vmem:[#allocation7 + $0xe0] ss:$16 sps:$4 sm:$0xff]  }
 0x10d   :  { %1623 = vmatpush1.bf16.msra.mxu0 %v3984_v8  ;;  %1795 = vmatpush1.bf16.msra.mxu1 %v3987_v9  ;;  %v4083_v8 = vld [vmem:[#allocation7 + $0x104] ss:$16 sps:$4 sm:$0xff]   ;;  %v4086_v9 = vld [vmem:[#allocation7 + $0x10c] ss:$16 sps:$4 sm:$0xff]  }
 0x10e   :  { %1624 = vmatprep.subr.bf16.mxu0 %v3992_v10  ;;  %1796 = vmatprep.subr.bf16.mxu1 %v3995_v11  ;;  %v4081_v10 = vld [vmem:[#allocation7 + $0x100] ss:$16 sps:$4 sm:$0xff]   ;;  %v4084_v11 = vld [vmem:[#allocation7 + $0x108] ss:$16 sps:$4 sm:$0xff]  }
 0x10f   :  { %1654 = vmatprep.mubr.bf16.mxu0 %v4385_v18  ;;  %1826 = vmatprep.mubr.bf16.mxu1 %v4385_v18  ;;  %v4093_v18 = vld [vmem:[#allocation7 + $0x140] ss:$16 sps:$4 sm:$0xff]  }
 0x111   :  { %1625 = vmatpush1.bf16.msra.mxu0 %v3990_v12  ;;  %1797 = vmatpush1.bf16.msra.mxu1 %v3993_v13  ;;  %v4089_v12 = vld [vmem:[#allocation7 + $0x124] ss:$16 sps:$4 sm:$0xff]   ;;  %v4092_v13 = vld [vmem:[#allocation7 + $0x12c] ss:$16 sps:$4 sm:$0xff]  }
 0x112   :  { %1626 = vmatprep.subr.bf16.mxu0 %v3998_v14  ;;  %1798 = vmatprep.subr.bf16.mxu1 %v4001_v15  ;;  %v4087_v14 = vld [vmem:[#allocation7 + $0x120] ss:$16 sps:$4 sm:$0xff]   ;;  %v4090_v15 = vld [vmem:[#allocation7 + $0x128] ss:$16 sps:$4 sm:$0xff]  }
 0x115   :  { %1627 = vmatpush1.bf16.msra.mxu0 %v3996_v16  ;;  %1799 = vmatpush1.bf16.msra.mxu1 %v3999_v17  ;;  %v4095_v16 = vld [vmem:[#allocation7 + $0x144] ss:$16 sps:$4 sm:$0xff]   ;;  %v4098_v17 = vld [vmem:[#allocation7 + $0x14c] ss:$16 sps:$4 sm:$0xff]  }
 0x116   :  { %1628 = vmatprep.subr.bf16.mxu0 %v4004_v19  ;;  %1800 = vmatprep.subr.bf16.mxu1 %v4007_v20  ;;  %v4096_v19 = vld [vmem:[#allocation7 + $0x148] ss:$16 sps:$4 sm:$0xff]   ;;  %v4101_v20 = vld [vmem:[#allocation7 + $0x164] ss:$16 sps:$4 sm:$0xff]  }
 0x119   :  { %1629 = vmatpush1.bf16.msra.mxu0 %v4002_v21  ;;  %1801 = vmatpush1.bf16.msra.mxu1 %v4005_v22  ;;  %v4104_v21 = vld [vmem:[#allocation7 + $0x16c] ss:$16 sps:$4 sm:$0xff]   ;;  %v4099_v22 = vld [vmem:[#allocation7 + $0x160] ss:$16 sps:$4 sm:$0xff]  }
 0x11a   :  { %1630 = vmatprep.subr.bf16.mxu0 %v4010_v23  ;;  %1802 = vmatprep.subr.bf16.mxu1 %v4013_v24  ;;  %v4102_v23 = vld [vmem:[#allocation7 + $0x168] ss:$16 sps:$4 sm:$0xff]   ;;  %v4107_v24 = vld [vmem:[#allocation7 + $0x184] ss:$16 sps:$4 sm:$0xff]  }
 0x11d   :  { %1631 = vmatpush1.bf16.msra.mxu0 %v4008_v25  ;;  %1803 = vmatpush1.bf16.msra.mxu1 %v4011_v26  ;;  %v4110_v25 = vld [vmem:[#allocation7 + $0x18c] ss:$16 sps:$4 sm:$0xff]   ;;  %v4105_v26 = vld [vmem:[#allocation7 + $0x180] ss:$16 sps:$4 sm:$0xff]  }
 0x11e   :  { %1632 = vmatprep.subr.bf16.mxu0 %v4016_v27  ;;  %1804 = vmatprep.subr.bf16.mxu1 %v4019_v28  ;;  %v4108_v27 = vld [vmem:[#allocation7 + $0x188] ss:$16 sps:$4 sm:$0xff]   ;;  %v4113_v28 = vld [vmem:[#allocation7 + $0x1a4] ss:$16 sps:$4 sm:$0xff]  }
 0x121   :  { %1633 = vmatpush1.bf16.msra.mxu0 %v4014_v29  ;;  %1805 = vmatpush1.bf16.msra.mxu1 %v4017_v30  ;;  %v4116_v29 = vld [vmem:[#allocation7 + $0x1ac] ss:$16 sps:$4 sm:$0xff]   ;;  %v4111_v30 = vld [vmem:[#allocation7 + $0x1a0] ss:$16 sps:$4 sm:$0xff]  }
 0x122   :  { %1634 = vmatprep.subr.bf16.mxu0 %v4022_v31  ;;  %1806 = vmatprep.subr.bf16.mxu1 %v4025_v32  ;;  %v4114_v31 = vld [vmem:[#allocation7 + $0x1a8] ss:$16 sps:$4 sm:$0xff]   ;;  %v4119_v32 = vld [vmem:[#allocation7 + $0x1c4] ss:$16 sps:$4 sm:$0xff]  }
 0x125   :  { %1635 = vmatpush1.bf16.msra.mxu0 %v4020_v33  ;;  %1807 = vmatpush1.bf16.msra.mxu1 %v4023_v34  ;;  %v4122_v33 = vld [vmem:[#allocation7 + $0x1cc] ss:$16 sps:$4 sm:$0xff]   ;;  %v4117_v34 = vld [vmem:[#allocation7 + $0x1c0] ss:$16 sps:$4 sm:$0xff]  }
 0x126   :  { %1636 = vmatprep.subr.bf16.mxu0 %v4028_v35  ;;  %1808 = vmatprep.subr.bf16.mxu1 %v4031_v36  ;;  %v4120_v35 = vld [vmem:[#allocation7 + $0x1c8] ss:$16 sps:$4 sm:$0xff]   ;;  %v4125_v36 = vld [vmem:[#allocation7 + $0x1e4] ss:$16 sps:$4 sm:$0xff]  }
 0x129   :  { %1637 = vmatpush1.bf16.msra.mxu0 %v4026_v37  ;;  %1809 = vmatpush1.bf16.msra.mxu1 %v4029_v38  ;;  %v4128_v37 = vld [vmem:[#allocation7 + $0x1ec] ss:$16 sps:$4 sm:$0xff]   ;;  %v4123_v38 = vld [vmem:[#allocation7 + $0x1e0] ss:$16 sps:$4 sm:$0xff]  }
 0x12a   :  { %2639 = vmatprep.subr.bf16.mxu0 %v4035_v39  ;;  %2725 = vmatprep.subr.bf16.mxu1 %v4038_v40  ;;  %v4126_v39 = vld [vmem:[#allocation7 + $0x1e8] ss:$16 sps:$4 sm:$0xff]   ;;  %v4131_v40 = vld [vmem:[#allocation7 + $0x204] ss:$16 sps:$4 sm:$0xff]  }
 0x12c   :  { %1655 = vmatmul.mubr.bf16.vlgmr.msra.gmra.mrb[0].mxu0 %v4032_v41  ;;  %1827 = vmatmul.mubr.bf16.vlgmr.msra.gmra.mrb[0].mxu1 %v4032_v41  ;;  %v4134_v41 = vld [vmem:[#allocation7 + $0x20c] ss:$16 sps:$4 sm:$0xff]  }
 0x12d   :  { %2640 = vmatpush1.bf16.msra.mxu0 %v4033_v42  ;;  %2726 = vmatpush1.bf16.msra.mxu1 %v4036_v43  ;;  %v317_v42 = vlaneseq }
 0x12e   :  { %2641 = vmatprep.subr.bf16.mxu0 %v4041_v44  ;;  %2727 = vmatprep.subr.bf16.mxu1 %v4044_v45 }
 0x12f   :  { %v4490_v43 = vshrl.u32 %v317_v42, 7  ;;  %v4168_v42 = vld [vmem:[#allocation7 + $0x2c8] ss:$16 sps:$4 sm:$0xff]  }
 0x131   :  { %2642 = vmatpush1.bf16.msra.mxu0 %v4039_v46  ;;  %2728 = vmatpush1.bf16.msra.mxu1 %v4042_v47  ;;  %v319_v44 = vsub.s32 0, %v4490_v43  ;;  %v327_v45 = vsub.s32 2, %v4490_v43  ;;  %v315_v46 = vld [vmem:[%s4539_s2] sm:$0xf]  ;;  %v323_v47 = vsub.s32 1, %v4490_v43 }
 0x132   :  { %2643 = vmatprep.subr.bf16.mxu0 %v4047_v48  ;;  %2729 = vmatprep.subr.bf16.mxu1 %v4050_v49  ;;  %v331_v48 = vsub.s32 3, %v4490_v43 }
 0x133   :  { %v320_v49 = vrot.slane %v315_v46, %v319_v44 }
 0x135   :  { %2644 = vmatpush1.bf16.msra.mxu0 %v4045_v50  ;;  %2730 = vmatpush1.bf16.msra.mxu1 %v4048_v51  ;;  %v328_v50 = vrot.slane %v315_v46, %v327_v45  ;;  %v324_v51 = vrot.slane %v315_v46, %v323_v47 }
 0x136   :  { %2645 = vmatprep.subr.bf16.mxu0 %v4053_v52  ;;  %2731 = vmatprep.subr.bf16.mxu1 %v4056_v53  ;;  %v332_v52 = vrot.slane %v315_v46, %v331_v48  ;;  %v4173_v46 = vld [vmem:[#allocation7 + $0x2e4] ss:$16 sps:$4 sm:$0xff]  }
 0x139   :  { %2646 = vmatpush1.bf16.msra.mxu0 %v4051_v54  ;;  %2732 = vmatpush1.bf16.msra.mxu1 %v4054_v55 }
 0x13a   :  { %2647 = vmatprep.subr.bf16.mxu0 %v4059_v56  ;;  %2733 = vmatprep.subr.bf16.mxu1 %v4062_v57 }
 0x13d   :  { %2648 = vmatpush1.bf16.msra.mxu0 %v4057_v58  ;;  %2734 = vmatpush1.bf16.msra.mxu1 %v4060_v59 }
 0x13e   :  { %2649 = vmatprep.subr.bf16.mxu0 %v4065_v60  ;;  %2735 = vmatprep.subr.bf16.mxu1 %v4068_v61 }
 0x141   :  { %2650 = vmatpush1.bf16.msra.mxu0 %v4063_v62  ;;  %2736 = vmatpush1.bf16.msra.mxu1 %v4066_v63 }
 0x142   :  { %2651 = vmatprep.subr.bf16.mxu0 %v4071_v0  ;;  %2737 = vmatprep.subr.bf16.mxu1 %v4074_v1 }
 0x145   :  { %2652 = vmatpush1.bf16.msra.mxu0 %v4069_v2  ;;  %2738 = vmatpush1.bf16.msra.mxu1 %v4072_v3 }
 0x146   :  { %2653 = vmatprep.subr.bf16.mxu0 %v4077_v4  ;;  %2739 = vmatprep.subr.bf16.mxu1 %v4080_v5 }
 0x149   :  { %2654 = vmatpush1.bf16.msra.mxu0 %v4075_v6  ;;  %2740 = vmatpush1.bf16.msra.mxu1 %v4078_v7 }
 0x14a   :  { %2655 = vmatprep.subr.bf16.mxu0 %v4083_v8  ;;  %2741 = vmatprep.subr.bf16.mxu1 %v4086_v9 }
 0x14d   :  { %2656 = vmatpush1.bf16.msra.mxu0 %v4081_v10  ;;  %2742 = vmatpush1.bf16.msra.mxu1 %v4084_v11 }
 0x14e   :  { %2657 = vmatprep.subr.bf16.mxu0 %v4089_v12  ;;  %2743 = vmatprep.subr.bf16.mxu1 %v4092_v13 }
 0x151   :  { %2658 = vmatpush1.bf16.msra.mxu0 %v4087_v14  ;;  %2744 = vmatpush1.bf16.msra.mxu1 %v4090_v15 }
 0x152   :  { %2659 = vmatprep.subr.bf16.mxu0 %v4095_v16  ;;  %2745 = vmatprep.subr.bf16.mxu1 %v4098_v17  ;;  %v4129_v17 = vld [vmem:[#allocation7 + $0x200] ss:$16 sps:$4 sm:$0xff]  }
 0x155   :  { %2660 = vmatpush1.bf16.msra.mxu0 %v4093_v18  ;;  %2746 = vmatpush1.bf16.msra.mxu1 %v4096_v19  ;;  %v4132_v18 = vld [vmem:[#allocation7 + $0x208] ss:$16 sps:$4 sm:$0xff]   ;;  %v4137_v19 = vld [vmem:[#allocation7 + $0x224] ss:$16 sps:$4 sm:$0xff]  }
 0x156   :  { %2661 = vmatprep.subr.bf16.mxu0 %v4101_v20  ;;  %2747 = vmatprep.subr.bf16.mxu1 %v4104_v21  ;;  %v4140_v20 = vld [vmem:[#allocation7 + $0x22c] ss:$16 sps:$4 sm:$0xff]   ;;  %v4135_v21 = vld [vmem:[#allocation7 + $0x220] ss:$16 sps:$4 sm:$0xff]  }
 0x159   :  { %2662 = vmatpush1.bf16.msra.mxu0 %v4099_v22  ;;  %2748 = vmatpush1.bf16.msra.mxu1 %v4102_v23  ;;  %v4138_v22 = vld [vmem:[#allocation7 + $0x228] ss:$16 sps:$4 sm:$0xff]   ;;  %v4143_v23 = vld [vmem:[#allocation7 + $0x244] ss:$16 sps:$4 sm:$0xff]  }
 0x15a   :  { %2663 = vmatprep.subr.bf16.mxu0 %v4107_v24  ;;  %2749 = vmatprep.subr.bf16.mxu1 %v4110_v25  ;;  %v4146_v24 = vld [vmem:[#allocation7 + $0x24c] ss:$16 sps:$4 sm:$0xff]   ;;  %v4141_v25 = vld [vmem:[#allocation7 + $0x240] ss:$16 sps:$4 sm:$0xff]  }
 0x15d   :  { %2664 = vmatpush1.bf16.msra.mxu0 %v4105_v26  ;;  %2750 = vmatpush1.bf16.msra.mxu1 %v4108_v27  ;;  %v4144_v26 = vld [vmem:[#allocation7 + $0x248] ss:$16 sps:$4 sm:$0xff]   ;;  %v4149_v27 = vld [vmem:[#allocation7 + $0x264] ss:$16 sps:$4 sm:$0xff]  }
 0x15e   :  { %2665 = vmatprep.subr.bf16.mxu0 %v4113_v28  ;;  %2751 = vmatprep.subr.bf16.mxu1 %v4116_v29  ;;  %v4152_v28 = vld [vmem:[#allocation7 + $0x26c] ss:$16 sps:$4 sm:$0xff]   ;;  %v4147_v29 = vld [vmem:[#allocation7 + $0x260] ss:$16 sps:$4 sm:$0xff]  }
 0x161   :  { %2666 = vmatpush1.bf16.msra.mxu0 %v4111_v30  ;;  %2752 = vmatpush1.bf16.msra.mxu1 %v4114_v31  ;;  %v4150_v30 = vld [vmem:[#allocation7 + $0x268] ss:$16 sps:$4 sm:$0xff]   ;;  %v4155_v31 = vld [vmem:[#allocation7 + $0x284] ss:$16 sps:$4 sm:$0xff]  }
 0x162   :  { %2667 = vmatprep.subr.bf16.mxu0 %v4119_v32  ;;  %2753 = vmatprep.subr.bf16.mxu1 %v4122_v33  ;;  %v4158_v32 = vld [vmem:[#allocation7 + $0x28c] ss:$16 sps:$4 sm:$0xff]   ;;  %v4153_v33 = vld [vmem:[#allocation7 + $0x280] ss:$16 sps:$4 sm:$0xff]  }
 0x165   :  { %2668 = vmatpush1.bf16.msra.mxu0 %v4117_v34  ;;  %2754 = vmatpush1.bf16.msra.mxu1 %v4120_v35  ;;  %v4156_v34 = vld [vmem:[#allocation7 + $0x288] ss:$16 sps:$4 sm:$0xff]   ;;  %v4161_v35 = vld [vmem:[#allocation7 + $0x2a4] ss:$16 sps:$4 sm:$0xff]  }
 0x166   :  { %2669 = vmatprep.subr.bf16.mxu0 %v4125_v36  ;;  %2755 = vmatprep.subr.bf16.mxu1 %v4128_v37  ;;  %v4164_v36 = vld [vmem:[#allocation7 + $0x2ac] ss:$16 sps:$4 sm:$0xff]   ;;  %v4159_v37 = vld [vmem:[#allocation7 + $0x2a0] ss:$16 sps:$4 sm:$0xff]  }
 0x169   :  { %2670 = vmatpush1.bf16.msra.mxu0 %v4123_v38  ;;  %2756 = vmatpush1.bf16.msra.mxu1 %v4126_v39  ;;  %v4162_v38 = vld [vmem:[#allocation7 + $0x2a8] ss:$16 sps:$4 sm:$0xff]   ;;  %v4167_v39 = vld [vmem:[#allocation7 + $0x2c4] ss:$16 sps:$4 sm:$0xff]  }
 0x16a   :  { %2682 = vmatprep.subr.bf16.mxu0 %v4131_v40  ;;  %2768 = vmatprep.subr.bf16.mxu1 %v4134_v41  ;;  %v4170_v40 = vld [vmem:[#allocation7 + $0x2cc] ss:$16 sps:$4 sm:$0xff]   ;;  %v4165_v41 = vld [vmem:[#allocation7 + $0x2c0] ss:$16 sps:$4 sm:$0xff]  }
 0x1ff   :  { %v1656_v53 = vpop.f32.mrb[0].mxu0  ;;  %v1828_v54 = vpop.f32.mrb[0].mxu1 }
 0x200   :  { %v3625_v55 = vadd.f32 %v1656_v53, %v320_v49  ;;  %v3629_v56 = vadd.f32 %v1828_v54, %v328_v50  ;;  %v1658_v57 = vpop.f32.mrb[1].mxu0  ;;  %v1830_v58 = vpop.f32.mrb[1].mxu1  ;;  %v4182_v53 = vld [vmem:[#allocation7 + $0x30c] ss:$16 sps:$4 sm:$0xff]   ;;  %v4177_v54 = vld [vmem:[#allocation7 + $0x300] ss:$16 sps:$4 sm:$0xff]  }
 0x201   :  { %v3626_v59 = vadd.f32 %v1658_v57, %v324_v51  ;;  %v3630_v60 = vadd.f32 %v1830_v58, %v332_v52  ;;  %v1660_v61 = vpop.f32.mrb[2].mxu0  ;;  %v1832_v62 = vpop.f32.mrb[2].mxu1  ;;  %v4188_v57 = vld [vmem:[#allocation7 + $0x32c] ss:$16 sps:$4 sm:$0xff]   ;;  %v4183_v58 = vld [vmem:[#allocation7 + $0x320] ss:$16 sps:$4 sm:$0xff]  }
 0x202   :  { %v3627_v63 = vadd.f32 %v1660_v61, %v320_v49  ;;  %v3631_v0 = vadd.f32 %v1832_v62, %v328_v50  ;;  %v1662_v1 = vpop.f32.mrb[3].mxu0  ;;  %v1834_v2 = vpop.f32.mrb[3].mxu1  ;;  %v1837_v5 = vmax.f32 %v3625_v55, 0.0  ;;  %v1839_v6 = vmax.f32 %v3629_v56, 0.0  ;;  %v4176_v49 = vld [vmem:[#allocation7 + $0x2ec] ss:$16 sps:$4 sm:$0xff]  }
 0x203   :  { %v3628_v3 = vadd.f32 %v1662_v1, %v324_v51  ;;  %v3632_v4 = vadd.f32 %v1834_v2, %v332_v52  ;;  %v1838_v9 = vmax.f32 %v3626_v59, 0.0  ;;  %v1840_v10 = vmax.f32 %v3630_v60, 0.0  ;;  %v4171_v50 = vld [vmem:[#allocation7 + $0x2e0] ss:$16 sps:$4 sm:$0xff]   ;;  %v4174_v51 = vld [vmem:[#allocation7 + $0x2e8] ss:$16 sps:$4 sm:$0xff]  }
 0x204   :  { %v1841_v7 = vmax.f32 %v3627_v63, 0.0  ;;  %v1843_v8 = vmax.f32 %v3631_v0, 0.0  ;;  %v4179_v52 = vld [vmem:[#allocation7 + $0x304] ss:$16 sps:$4 sm:$0xff]   ;;  %v4180_v55 = vld [vmem:[#allocation7 + $0x308] ss:$16 sps:$4 sm:$0xff]  }
 0x205   :  { %v1842_v11 = vmax.f32 %v3628_v3, 0.0  ;;  %v1844_v12 = vmax.f32 %v3632_v4, 0.0  ;;  %v4185_v56 = vld [vmem:[#allocation7 + $0x324] ss:$16 sps:$4 sm:$0xff]   ;;  %v4186_v59 = vld [vmem:[#allocation7 + $0x328] ss:$16 sps:$4 sm:$0xff]  }
 0x206   :  { %v1845_v13 = vpack.c.bf16 %v1841_v7, %v1837_v5  ;;  %v4507_v14 = vpack.c.bf16 %v1843_v8, %v1839_v6  ;;  %v4191_v60 = vld [vmem:[#allocation7 + $0x344] ss:$16 sps:$4 sm:$0xff]   ;;  %v4194_v61 = vld [vmem:[#allocation7 + $0x34c] ss:$16 sps:$4 sm:$0xff]   ;;  %v4189_v62 = vld [vmem:[#allocation7 + $0x340] ss:$16 sps:$4 sm:$0xff]  }
 0x207   :  { %v1846_v15 = vpack.c.bf16 %v1842_v11, %v1838_v9  ;;  %v1848_v16 = vpack.c.bf16 %v1844_v12, %v1840_v10  ;;  %v4192_v63 = vld [vmem:[#allocation7 + $0x348] ss:$16 sps:$4 sm:$0xff]   ;;  %v4197_v0 = vld [vmem:[#allocation7 + $0x364] ss:$16 sps:$4 sm:$0xff]   ;;  %v4200_v1 = vld [vmem:[#allocation7 + $0x36c] ss:$16 sps:$4 sm:$0xff]  }
 0x208   :  { %v4195_v2 = vld [vmem:[#allocation7 + $0x360] ss:$16 sps:$4 sm:$0xff]   ;;  %v4198_v3 = vld [vmem:[#allocation7 + $0x368] ss:$16 sps:$4 sm:$0xff]   ;;  %v4203_v4 = vld [vmem:[#allocation7 + $0x384] ss:$16 sps:$4 sm:$0xff]  }
 0x209   :  { %2671 = vmatprep.mubr.bf16.mxu0 %v1846_v15  ;;  %2757 = vmatprep.mubr.bf16.mxu1 %v1846_v15  ;;  %v4206_v5 = vld [vmem:[#allocation7 + $0x38c] ss:$16 sps:$4 sm:$0xff]   ;;  %v4201_v6 = vld [vmem:[#allocation7 + $0x380] ss:$16 sps:$4 sm:$0xff]   ;;  %v4204_v7 = vld [vmem:[#allocation7 + $0x388] ss:$16 sps:$4 sm:$0xff]  }
 0x20a   :  { %2672 = vmatmul.mubr.bf16.vlgmr.msra.gmra.mrb[4].mxu0 %v1845_v13  ;;  %2758 = vmatmul.mubr.bf16.vlgmr.msra.gmra.mrb[4].mxu1 %v1845_v13  ;;  %v4209_v8 = vld [vmem:[#allocation7 + $0x3a4] ss:$16 sps:$4 sm:$0xff]   ;;  %v4212_v9 = vld [vmem:[#allocation7 + $0x3ac] ss:$16 sps:$4 sm:$0xff]   ;;  %v4207_v10 = vld [vmem:[#allocation7 + $0x3a0] ss:$16 sps:$4 sm:$0xff]  }
 0x20b   :  { %2683 = vmatpush1.bf16.msra.mxu0 %v4129_v17  ;;  %2769 = vmatpush1.bf16.msra.mxu1 %v4132_v18  ;;  %v4210_v11 = vld [vmem:[#allocation7 + $0x3a8] ss:$16 sps:$4 sm:$0xff]   ;;  %v4215_v12 = vld [vmem:[#allocation7 + $0x3c4] ss:$16 sps:$4 sm:$0xff]   ;;  %v4218_v13 = vld [vmem:[#allocation7 + $0x3cc] ss:$16 sps:$4 sm:$0xff]  }
 0x20c   :  { %2714 = vmatprep.mubr.bf16.mxu0 %v1848_v16  ;;  %2800 = vmatprep.mubr.bf16.mxu1 %v1848_v16  ;;  %v4213_v15 = vld [vmem:[#allocation7 + $0x3c0] ss:$16 sps:$4 sm:$0xff]   ;;  %v4216_v16 = vld [vmem:[#allocation7 + $0x3c8] ss:$16 sps:$4 sm:$0xff]   ;;  %v4221_v17 = vld [vmem:[#allocation7 + $0x3e4] ss:$16 sps:$4 sm:$0xff]  }
 0x20d   :  { %2684 = vmatprep.subr.bf16.mxu0 %v4137_v19  ;;  %2770 = vmatprep.subr.bf16.mxu1 %v4140_v20  ;;  %v4224_v18 = vld [vmem:[#allocation7 + $0x3ec] ss:$16 sps:$4 sm:$0xff]   ;;  %v4219_v19 = vld [vmem:[#allocation7 + $0x3e0] ss:$16 sps:$4 sm:$0xff]   ;;  %v4222_v20 = vld [vmem:[#allocation7 + $0x3e8] ss:$16 sps:$4 sm:$0xff]  }
 0x20f   :  { %2685 = vmatpush1.bf16.msra.mxu0 %v4135_v21  ;;  %2771 = vmatpush1.bf16.msra.mxu1 %v4138_v22  ;;  %v4225_v21 = vld [vmem:[#allocation8 + $0x40] sm:$0xff]  }
 0x210   :  { %2686 = vmatprep.subr.bf16.mxu0 %v4143_v23  ;;  %2772 = vmatprep.subr.bf16.mxu1 %v4146_v24  ;;  %v4226_v22 = vld [vmem:[#allocation8 + $0xc0] sm:$0xff]  }
 0x211   :  { %v4227_v23 = vld [vmem:[#allocation8] sm:$0xff]  }
 0x212   :  { %v4228_v24 = vld [vmem:[#allocation8 + $0x80] sm:$0xff]  }
 0x213   :  { %2687 = vmatpush1.bf16.msra.mxu0 %v4141_v25  ;;  %2773 = vmatpush1.bf16.msra.mxu1 %v4144_v26  ;;  %v4229_v25 = vld [vmem:[#allocation8 + $0x48] sm:$0xff]  }
 0x214   :  { %2688 = vmatprep.subr.bf16.mxu0 %v4149_v27  ;;  %2774 = vmatprep.subr.bf16.mxu1 %v4152_v28  ;;  %v4230_v26 = vld [vmem:[#allocation8 + $0xc8] sm:$0xff]  }
 0x215   :  { %v4231_v27 = vld [vmem:[#allocation8 + $0x8] sm:$0xff]  }
 0x216   :  { %v4232_v28 = vld [vmem:[#allocation8 + $0x88] sm:$0xff]  }
 0x217   :  { %2689 = vmatpush1.bf16.msra.mxu0 %v4147_v29  ;;  %2775 = vmatpush1.bf16.msra.mxu1 %v4150_v30  ;;  %v4233_v29 = vld [vmem:[#allocation8 + $0x50] sm:$0xff]  }
 0x218   :  { %2690 = vmatprep.subr.bf16.mxu0 %v4155_v31  ;;  %2776 = vmatprep.subr.bf16.mxu1 %v4158_v32  ;;  %v4234_v30 = vld [vmem:[#allocation8 + $0xd0] sm:$0xff]  }
 0x219   :  { %v4235_v31 = vld [vmem:[#allocation8 + $0x10] sm:$0xff]  }
 0x21a   :  { %v4236_v32 = vld [vmem:[#allocation8 + $0x90] sm:$0xff]  }
 0x21b   :  { %2691 = vmatpush1.bf16.msra.mxu0 %v4153_v33  ;;  %2777 = vmatpush1.bf16.msra.mxu1 %v4156_v34  ;;  %v4237_v33 = vld [vmem:[#allocation8 + $0x58] sm:$0xff]  }
 0x21c   :  { %2692 = vmatprep.subr.bf16.mxu0 %v4161_v35  ;;  %2778 = vmatprep.subr.bf16.mxu1 %v4164_v36  ;;  %v4238_v34 = vld [vmem:[#allocation8 + $0xd8] sm:$0xff]   ;;  %v4241_v36 = vld [vmem:[#allocation8 + $0x60] sm:$0xff]  }
 0x21d   :  { %v4239_v35 = vld [vmem:[#allocation8 + $0x18] sm:$0xff]  }
 0x21f   :  { %2693 = vmatpush1.bf16.msra.mxu0 %v4159_v37  ;;  %2779 = vmatpush1.bf16.msra.mxu1 %v4162_v38  ;;  %v4242_v37 = vld [vmem:[#allocation8 + $0xe0] sm:$0xff]  }
 0x220   :  { %2694 = vmatprep.subr.bf16.mxu0 %v4167_v39  ;;  %2780 = vmatprep.subr.bf16.mxu1 %v4170_v40  ;;  %v4243_v38 = vld [vmem:[#allocation8 + $0x20] sm:$0xff]   ;;  %v4245_v40 = vld [vmem:[#allocation8 + $0x68] sm:$0xff]  }
 0x221   :  { %v4244_v39 = vld [vmem:[#allocation8 + $0xa0] sm:$0xff]  }
 0x223   :  { %2695 = vmatpush1.bf16.msra.mxu0 %v4165_v41  ;;  %2781 = vmatpush1.bf16.msra.mxu1 %v4168_v42  ;;  %v4246_v41 = vld [vmem:[#allocation8 + $0xe8] sm:$0xff]  }
 0x224   :  { %2696 = vmatprep.subr.bf16.mxu0 %v4173_v46  ;;  %2782 = vmatprep.subr.bf16.mxu1 %v4176_v49  ;;  %v4247_v42 = vld [vmem:[#allocation8 + $0x28] sm:$0xff]   ;;  %v4249_v49 = vld [vmem:[#allocation8 + $0x70] sm:$0xff]  }
 0x225   :  { %v4248_v46 = vld [vmem:[#allocation8 + $0xa8] sm:$0xff]  }
 0x227   :  { %2697 = vmatpush1.bf16.msra.mxu0 %v4171_v50  ;;  %2783 = vmatpush1.bf16.msra.mxu1 %v4174_v51  ;;  %v4250_v50 = vld [vmem:[#allocation8 + $0xf0] sm:$0xff]  }
 0x228   :  { %2698 = vmatprep.subr.bf16.mxu0 %v4179_v52  ;;  %2784 = vmatprep.subr.bf16.mxu1 %v4182_v53  ;;  %v4251_v51 = vld [vmem:[#allocation8 + $0x30] sm:$0xff]   ;;  %v4253_v53 = vld [vmem:[#allocation8 + $0x78] sm:$0xff]  }
 0x229   :  { %v4252_v52 = vld [vmem:[#allocation8 + $0xb0] sm:$0xff]  }
 0x22b   :  { %2699 = vmatpush1.bf16.msra.mxu0 %v4177_v54  ;;  %2785 = vmatpush1.bf16.msra.mxu1 %v4180_v55  ;;  %v4254_v54 = vld [vmem:[#allocation8 + $0xf8] sm:$0xff]  }
 0x22c   :  { %2700 = vmatprep.subr.bf16.mxu0 %v4185_v56  ;;  %2786 = vmatprep.subr.bf16.mxu1 %v4188_v57  ;;  %v4255_v55 = vld [vmem:[#allocation8 + $0x38] sm:$0xff]   ;;  %v1977_v57 = vld [vmem:[%s4541_s4] sm:$0xf] }
 0x22d   :  { %v4256_v56 = vld [vmem:[#allocation8 + $0xb8] sm:$0xff]  }
 0x22f   :  { %2701 = vmatpush1.bf16.msra.mxu0 %v4183_v58  ;;  %2787 = vmatpush1.bf16.msra.mxu1 %v4186_v59  ;;  %v1982_v58 = vrot.slane %v1977_v57, %v319_v44  ;;  %v1990_v59 = vrot.slane %v1977_v57, %v327_v45 }
 0x230   :  { %2702 = vmatprep.subr.bf16.mxu0 %v4191_v60  ;;  %2788 = vmatprep.subr.bf16.mxu1 %v4194_v61  ;;  %v1986_v60 = vrot.slane %v1977_v57, %v323_v47  ;;  %v1994_v61 = vrot.slane %v1977_v57, %v331_v48 }
 0x233   :  { %2703 = vmatpush1.bf16.msra.mxu0 %v4189_v62  ;;  %2789 = vmatpush1.bf16.msra.mxu1 %v4192_v63 }
 0x234   :  { %2704 = vmatprep.subr.bf16.mxu0 %v4197_v0  ;;  %2790 = vmatprep.subr.bf16.mxu1 %v4200_v1 }
 0x237   :  { %2705 = vmatpush1.bf16.msra.mxu0 %v4195_v2  ;;  %2791 = vmatpush1.bf16.msra.mxu1 %v4198_v3 }
 0x238   :  { %2706 = vmatprep.subr.bf16.mxu0 %v4203_v4  ;;  %2792 = vmatprep.subr.bf16.mxu1 %v4206_v5 }
 0x23b   :  { %2707 = vmatpush1.bf16.msra.mxu0 %v4201_v6  ;;  %2793 = vmatpush1.bf16.msra.mxu1 %v4204_v7 }
 0x23c   :  { %2708 = vmatprep.subr.bf16.mxu0 %v4209_v8  ;;  %2794 = vmatprep.subr.bf16.mxu1 %v4212_v9 }
 0x23f   :  { %2709 = vmatpush1.bf16.msra.mxu0 %v4207_v10  ;;  %2795 = vmatpush1.bf16.msra.mxu1 %v4210_v11 }
 0x240   :  { %2710 = vmatprep.subr.bf16.mxu0 %v4215_v12  ;;  %2796 = vmatprep.subr.bf16.mxu1 %v4218_v13 }
 0x243   :  { %2711 = vmatpush1.bf16.msra.mxu0 %v4213_v15  ;;  %2797 = vmatpush1.bf16.msra.mxu1 %v4216_v16 }
 0x244   :  { %2712 = vmatprep.subr.bf16.mxu0 %v4221_v17  ;;  %2798 = vmatprep.subr.bf16.mxu1 %v4224_v18 }
 0x247   :  { %2713 = vmatpush1.bf16.msra.mxu0 %v4219_v19  ;;  %2799 = vmatpush1.bf16.msra.mxu1 %v4222_v20 }
 0x248   :  { %3581 = vmatprep.subr.bf16.mxu0 %v4225_v21  ;;  %3603 = vmatprep.subr.bf16.mxu1 %v4226_v22 }
 0x24a   :  { %2715 = vmatmul.mubr.bf16.vlgmr.msra.gmra.mrb[4].mxu0 %v4507_v14  ;;  %2801 = vmatmul.mubr.bf16.vlgmr.msra.gmra.mrb[4].mxu1 %v4507_v14  ;;  %v4240_v14 = vld [vmem:[#allocation8 + $0x98] sm:$0xff]  }
 0x24b   :  { %3582 = vmatpush3.bf16.msra.mxu0 %v4227_v23  ;;  %3604 = vmatpush3.bf16.msra.mxu1 %v4228_v24  ;;  %v3548_v24 = vld [vmem:[%s4543_s6] ss:$0 sm:$0xff]  ;;  %s4345_s6 = scalar_lea.vmem %s3176_s9, 256 }
 0x24c   :  { %3583 = vmatprep.subr.bf16.mxu0 %v4229_v25  ;;  %3605 = vmatprep.subr.bf16.mxu1 %v4230_v26  ;;  %p4346_p4 = scmp.ne.s32.totalorder %s3176_s9, %s4345_s6  ;;  %p4351_p6 = scmp.lt.s32.totalorder %s4345_s6, %s4345_s6 }
 0x24e   :  { %p4352_p7 = por %p4351_p6, %p4350_p5 }
 0x24f   :  { %3584 = vmatpush3.bf16.msra.mxu0 %v4231_v27  ;;  %3606 = vmatpush3.bf16.msra.mxu1 %v4232_v28 }
 0x250   :  { %3585 = vmatprep.subr.bf16.mxu0 %v4233_v29  ;;  %3607 = vmatprep.subr.bf16.mxu1 %v4234_v30  ;;  %p4353_p8 = pnand %p4352_p7, %p4346_p4 }
 0x253   :  { %3586 = vmatpush3.bf16.msra.mxu0 %v4235_v31  ;;  %3608 = vmatpush3.bf16.msra.mxu1 %v4236_v32 }
 0x254   :  { %3587 = vmatprep.subr.bf16.mxu0 %v4237_v33  ;;  %3609 = vmatprep.subr.bf16.mxu1 %v4238_v34 }
 0x257   :  { %3588 = vmatpush3.bf16.msra.mxu0 %v4239_v35  ;;  %3610 = vmatpush3.bf16.msra.mxu1 %v4240_v14 }
 0x258   :  { %3589 = vmatprep.subr.bf16.mxu0 %v4241_v36  ;;  %3611 = vmatprep.subr.bf16.mxu1 %v4242_v37 }
 0x25b   :  { %3590 = vmatpush3.bf16.msra.mxu0 %v4243_v38  ;;  %3612 = vmatpush3.bf16.msra.mxu1 %v4244_v39 }
 0x25c   :  { %3591 = vmatprep.subr.bf16.mxu0 %v4245_v40  ;;  %3613 = vmatprep.subr.bf16.mxu1 %v4246_v41 }
 0x25f   :  { %3592 = vmatpush3.bf16.msra.mxu0 %v4247_v42  ;;  %3614 = vmatpush3.bf16.msra.mxu1 %v4248_v46 }
 0x260   :  { %3593 = vmatprep.subr.bf16.mxu0 %v4249_v49  ;;  %3615 = vmatprep.subr.bf16.mxu1 %v4250_v50 }
 0x263   :  { %3594 = vmatpush3.bf16.msra.mxu0 %v4251_v51  ;;  %3616 = vmatpush3.bf16.msra.mxu1 %v4252_v52 }
 0x264   :  { %3595 = vmatprep.subr.bf16.mxu0 %v4253_v53  ;;  %3617 = vmatprep.subr.bf16.mxu1 %v4254_v54 }
 0x267   :  { %3596 = vmatpush3.bf16.msra.mxu0 %v4255_v55  ;;  %3618 = vmatpush3.bf16.msra.mxu1 %v4256_v56 }
 0x31d   :  { %v2716_v62 = vpop.f32.mrb[4].mxu0  ;;  %v2802_v63 = vpop.f32.mrb[4].mxu1 }
 0x31e   :  { %v3633_v0 = vadd.f32 %v2716_v62, %v1982_v58  ;;  %v3637_v1 = vadd.f32 %v2802_v63, %v1990_v59  ;;  %v2718_v2 = vpop.f32.mrb[5].mxu0  ;;  %v2804_v3 = vpop.f32.mrb[5].mxu1 }
 0x31f   :  { %v3634_v4 = vadd.f32 %v2718_v2, %v1986_v60  ;;  %v3638_v5 = vadd.f32 %v2804_v3, %v1994_v61  ;;  %v2720_v6 = vpop.f32.mrb[6].mxu0  ;;  %v2806_v7 = vpop.f32.mrb[6].mxu1 }
 0x320   :  { %v3635_v44 = vadd.f32 %v2720_v6, %v1982_v58  ;;  %v3639_v8 = vadd.f32 %v2806_v7, %v1990_v59  ;;  %v2722_v9 = vpop.f32.mrb[7].mxu0  ;;  %v2808_v45 = vpop.f32.mrb[7].mxu1  ;;  %v2811_v47 = vmax.f32 %v3633_v0, 0.0  ;;  %v2813_v12 = vmax.f32 %v3637_v1, 0.0 }
 0x321   :  { %v3636_v10 = vadd.f32 %v2722_v9, %v1986_v60  ;;  %v3640_v11 = vadd.f32 %v2808_v45, %v1994_v61  ;;  %v2812_v13 = vmax.f32 %v3634_v4, 0.0  ;;  %v2814_v15 = vmax.f32 %v3638_v5, 0.0 }
 0x322   :  { %v2815_v43 = vmax.f32 %v3635_v44, 0.0  ;;  %v2817_v48 = vmax.f32 %v3639_v8, 0.0 }
 0x323   :  { %v2816_v16 = vmax.f32 %v3636_v10, 0.0  ;;  %v2818_v17 = vmax.f32 %v3640_v11, 0.0 }
 0x324   :  { %v2819_v18 = vpack.c.bf16 %v2815_v43, %v2811_v47  ;;  %v2821_v19 = vpack.c.bf16 %v2817_v48, %v2813_v12 }
 0x325   :  { %v2820_v20 = vpack.c.bf16 %v2816_v16, %v2812_v13  ;;  %v2822_v21 = vpack.c.bf16 %v2818_v17, %v2814_v15 }
 0x327   :  { %3118 = vmatprep.mubr.bf16.mxu0 %v2820_v20  ;;  %3159 = vmatprep.mubr.bf16.mxu1 %v2822_v21 }
 0x328   :  { %3119 = vmatmul.mubr.bf16.vlgmr.msra.gmra.mrb[8].mxu0 %v2819_v18  ;;  %3160 = vmatmul.mubr.bf16.vlgmr.msra.gmra.mrb[8].mxu1 %v2821_v19 }
 0x3fb   :  { %v3597_v22 = vpop.f32.mrb[8].mxu0  ;;  %v3619_v23 = vpop.f32.mrb[8].mxu1 }
 0x3fc   :  { %v3598_v25 = vpop.f32.mrb[9].mxu0  ;;  %v3620_v26 = vpop.f32.mrb[9].mxu1 }
 0x3fd   :  { %v3599_v27 = vadd.f32 %v3598_v25, %v3597_v22  ;;  %v3621_v28 = vadd.f32 %v3620_v26, %v3619_v23  ;;  %v3600_v29 = vpop.f32.mrb[10].mxu0  ;;  %v3622_v30 = vpop.f32.mrb[10].mxu1 }
 0x3fe   :  { %v3601_v31 = vpop.f32.mrb[11].mxu0  ;;  %v3623_v32 = vpop.f32.mrb[11].mxu1 }
 0x3ff   :  { %v3121_v33 = vadd.f32 %v3599_v27, %v3548_v24  ;;  %v3602_v34 = vadd.f32 %v3601_v31, %v3600_v29  ;;  %v3624_v35 = vadd.f32 %v3623_v32, %v3622_v30 }
 0x401   :  { %v3162_v14 = vadd.f32 %v3621_v28, %v3121_v33  ;;  %v3124_v36 = vadd.f32 %v3602_v34, %v3548_v24 }
 0x403   :  { %3168 = vst [vmem:[#allocation10] sm:$0xff] %v3162_v14  ;;  %v3165_v37 = vadd.f32 %v3624_v35, %v3124_v36 }
 0x405   :  { %3169 = vst [vmem:[#allocation10 + $0x8] sm:$0xff] %v3165_v37 }
 0x406   :  { %4356 = shalt.err (!%p4353_p8)
}
 0x407   :  { %s4357_s14 = scalar_lea.hbm %s4544_s7, 256 }
 0x408   :  { %p4358_p9 = scmp.ne.s32.totalorder %s4544_s7, %s4357_s14  ;;  %p4361_p10 = scmp.lt.u32.totalorder %s4357_s14, %s4544_s7 }
 0x40a   :  { %p4363_p11 = pnand %p4361_p10, %p4358_p9 }
 0x40c   :  { %4366 = shalt.err (!%p4363_p11)
}
 0x40d   :  { %s4387_s16 = smov 128   ;;  %s4388_s19 = smov 8  }
 0x40e   :  { %3181 = dma.vmem_to_hbm [thread:$0]  %s3176_s9, 256, %s4544_s7, [#allocation4], %s4387_s16, %s4387_s16, %s4388_s19  }
 0x40f   :  { %4373 = dma.done.wait [#allocation4], 256  }
 0x410   :  { %4374 = vsyncadd [#allocation4], 4294967040 }
 0x411   :  { %3185 = vsyncpa [#allocation3], 1 }
 0x412   :  { %3186 = vsyncpa [#allocation6], 1 }
 0x413   :  { %3187 = vsyncpa [#allocation9], 1 }
 0x414   :  { %3188 = vsyncpa [#allocation4], 1 }

</bundles_post_ra>
